<compile_context>
chip_gen: v7x
topology: tpu7x:2x2x1
jax: 0.10.0
libtpu: 0.0.40
codegen_flags: <defaults>
</compile_context>

<pallas_src>
import functools

import jax
import jax.numpy as jnp
import numpy as np
from jax.experimental import pallas as pl
from jax.experimental.pallas import tpu as pltpu


def _dwsep_kernel(x_ref, dww_ref, pww_ref, fb_ref, out_ref, xpad_ref, *,
                  C, Cout, KH, KW, stride, dilation, padding, H, W, Ho, Wo):
    """One batch element per grid step.  Channel-major / W-minor layout.

    x_ref   : (1, C, H, W)       input image (NCHW block)            [VMEM]
    dww_ref : (C*KH*KW,)         depthwise weights, scalar access     [SMEM]
    pww_ref : (Cout*C,)          pointwise weights, scalar access     [SMEM]
    fb_ref  : (Cout,)            fused bias = pw @ dw_bias + pw_bias  [SMEM]
    out_ref : (1, Cout, Ho, Wo)  output block (used as accumulator)   [VMEM]
    xpad_ref: (C, Hp, Wp)        zero-padded staging scratch          [VMEM]
    """
    # ---- stage the image into a zero-padded scratch (in-kernel padding) ----
    if padding > 0:
        xpad_ref[...] = jnp.zeros(xpad_ref.shape, xpad_ref.dtype)
        xpad_ref[:, pl.ds(padding, H), pl.ds(padding, W)] = x_ref[0]

        def tap(c, h0, hsz, w0, wsz):
            return xpad_ref[c, pl.ds(h0, hsz), pl.ds(w0, wsz)]
    else:
        # No padding: read taps straight from the input block.
        def tap(c, h0, hsz, w0, wsz):
            return x_ref[0, c, pl.ds(h0, hsz), pl.ds(w0, wsz)]

    hsz = (Ho - 1) * stride + 1
    wsz = (Wo - 1) * stride + 1

    # ---- fused depthwise + pointwise, one input channel at a time ----------
    for c in range(C):
        # Depthwise conv for channel c: KHxKW VPU MACs over ref-sliced windows.
        d_c = None
        for kh in range(KH):
            for kw in range(KW):
                win = tap(c, kh * dilation, hsz, kw * dilation, wsz)
                if stride > 1:
                    # Rarely-used general path (test uses stride=1).
                    win = jax.lax.slice(win, (0, 0), win.shape,
                                        (stride, stride))
                w_s = dww_ref[c * KH * KW + kh * KW + kw]       # SMEM scalar
                t = win * w_s
                d_c = t if d_c is None else d_c + t

        # Pointwise 1x1: scatter-accumulate d_c into every output channel of
        # the VMEM-resident output block, scalar weights from SMEM (no MXU
        # for these tiny C/Cout; everything stays on the VPU).
        for co in range(Cout):
            p = pww_ref[co * C + c]                              # SMEM scalar
            if c == 0:
                out_ref[0, co] = d_c * p + fb_ref[co]
            else:
                out_ref[0, co] = out_ref[0, co] + d_c * p


def depthwise_separable_conv2d(x_nchw, dw_weight, dw_bias, pw_weight, pw_bias,
                               *, stride=1, padding=0, dilation=1):
    """x_nchw: (N, C, H, W) float32.  Returns (N, Cout, Ho, Wo) float32.

    dw_weight: (C, 1, KH, KW)   (PyTorch depthwise layout)
    dw_bias  : (C,)
    pw_weight: (Cout, C, 1, 1)  (PyTorch pointwise layout)
    pw_bias  : (Cout,)
    """
    N, C, H, W = x_nchw.shape
    KH, KW = dw_weight.shape[2], dw_weight.shape[3]
    Cout = pw_weight.shape[0]

    Ho = (H + 2 * padding - dilation * (KH - 1) - 1) // stride + 1
    Wo = (W + 2 * padding - dilation * (KW - 1) - 1) // stride + 1
    Hp, Wp = H + 2 * padding, W + 2 * padding

    # Tiny O(C*Cout*K*K) weight prep -- no per-pixel HBM traffic.
    dww = dw_weight.astype(jnp.float32).reshape(C * KH * KW)     # [c,kh,kw]
    pw2d = pw_weight[:, :, 0, 0].astype(jnp.float32)             # (Cout, C)
    pww = pw2d.reshape(Cout * C)                                 # [co,c]
    fused_bias = pw2d @ dw_bias.astype(jnp.float32) + pw_bias.astype(jnp.float32)

    kernel = functools.partial(
        _dwsep_kernel, C=C, Cout=Cout, KH=KH, KW=KW, stride=stride,
        dilation=dilation, padding=padding, H=H, W=W, Ho=Ho, Wo=Wo)

    return pl.pallas_call(
        kernel,
        out_shape=jax.ShapeDtypeStruct((N, Cout, Ho, Wo), jnp.float32),
        grid_spec=pltpu.PrefetchScalarGridSpec(
            num_scalar_prefetch=0,
            grid=(N,),
            in_specs=[
                pl.BlockSpec((1, C, H, W), lambda n: (n, 0, 0, 0)),
                pl.BlockSpec(memory_space=pltpu.MemorySpace.SMEM),
                pl.BlockSpec(memory_space=pltpu.MemorySpace.SMEM),
                pl.BlockSpec(memory_space=pltpu.MemorySpace.SMEM),
            ],
            out_specs=pl.BlockSpec((1, Cout, Ho, Wo), lambda n: (n, 0, 0, 0)),
            scratch_shapes=[pltpu.VMEM((C, Hp, Wp), jnp.float32)],
        ),
        compiler_params=pltpu.CompilerParams(
            dimension_semantics=("parallel",),
            vmem_limit_bytes=32 * 1024 * 1024),
    )(x_nchw, dww, pww, fused_bias)


def _reference(x_nchw, dw_weight, dw_bias, pw_weight, pw_bias,
               *, stride, padding, dilation):
    """Pure-JAX reference mirroring the PyTorch module (NCHW convs)."""
    C = x_nchw.shape[1]
    dn = jax.lax.conv_dimension_numbers(x_nchw.shape, dw_weight.shape,
                                        ("NCHW", "OIHW", "NCHW"))
    y = jax.lax.conv_general_dilated(
        x_nchw, dw_weight, window_strides=(stride, stride),
        padding=[(padding, padding), (padding, padding)],
        rhs_dilation=(dilation, dilation), dimension_numbers=dn,
        feature_group_count=C)
    y = y + dw_bias[None, :, None, None]
    dn2 = jax.lax.conv_dimension_numbers(y.shape, pw_weight.shape,
                                         ("NCHW", "OIHW", "NCHW"))
    z = jax.lax.conv_general_dilated(
        y, pw_weight, window_strides=(1, 1), padding=[(0, 0), (0, 0)],
        dimension_numbers=dn2)
    return z + pw_bias[None, :, None, None]


if __name__ == "__main__":
    # Module config (synthetic, deterministic init).
    in_channels, out_channels = 4, 8
    kernel_size, stride, padding, dilation = 3, 1, 1, 1
    N, H, W = 2, 16, 16

    key = jax.random.PRNGKey(0)
    kx, k1, k2, k3, k4 = jax.random.split(key, 5)

    x = jax.random.normal(kx, (N, in_channels, H, W), dtype=jnp.float32)
    dw_weight = 0.1 * jax.random.normal(
        k1, (in_channels, 1, kernel_size, kernel_size), dtype=jnp.float32)
    dw_bias = 0.1 * jax.random.normal(k2, (in_channels,), dtype=jnp.float32)
    pw_weight = 0.1 * jax.random.normal(
        k3, (out_channels, in_channels, 1, 1), dtype=jnp.float32)
    pw_bias = 0.1 * jax.random.normal(k4, (out_channels,), dtype=jnp.float32)

    out = depthwise_separable_conv2d(
        x, dw_weight, dw_bias, pw_weight, pw_bias,
        stride=stride, padding=padding, dilation=dilation)
    out = jax.block_until_ready(out)

    ref = _reference(x, dw_weight, dw_bias, pw_weight, pw_bias,
                     stride=stride, padding=padding, dilation=dilation)
    np.testing.assert_allclose(np.asarray(out), np.asarray(ref),
                               rtol=1e-4, atol=1e-4)

    print("KERNEL_OK")
</pallas_src>

<mosaic_0001>
module attributes {stable_mosaic.version = 11 : i64} {
  func.func @_dwsep_kernel(%arg0: i32, %arg1: memref<1x4x16x16xf32, #tpu.memory_space<vmem>>, %arg2: memref<36xf32, #tpu.memory_space<smem>>, %arg3: memref<32xf32, #tpu.memory_space<smem>>, %arg4: memref<8xf32, #tpu.memory_space<smem>>, %arg5: memref<1x8x16x16xf32, #tpu.memory_space<vmem>>, %arg6: memref<4x18x18xf32, #tpu.memory_space<vmem>>) attributes {dimension_semantics = [#tpu.dimension_semantics<parallel>], iteration_bounds = array<i64: 2>, scalar_prefetch = 0 : i64, scratch_operands = 1 : i64, tpu.core_type = #tpu.core_type<tc>, window_params = [{transform_indices = @transform_0, window_bounds = array<i64: 1, 4, 16, 16>}, {transform_indices = @transform_1, window_bounds = array<i64: 36>}, {transform_indices = @transform_2, window_bounds = array<i64: 32>}, {transform_indices = @transform_3, window_bounds = array<i64: 8>}, {transform_indices = @transform_4, window_bounds = array<i64: 1, 8, 16, 16>}]} {
    %cst = arith.constant 0.000000e+00 : f32
    %0 = vector.broadcast %cst : f32 to vector<4x18x18xf32>
    %c0 = arith.constant 0 : index
    %c0_0 = arith.constant 0 : index
    %c0_1 = arith.constant 0 : index
    %1 = vector.load %arg6[%c0, %c0_0, %c0_1] : memref<4x18x18xf32, #tpu.memory_space<vmem>>, vector<4x18x18xf32>
    tpu.vector_store %arg6[%c0, %c0_0, %c0_1], %0 {strides = array<i32>} : memref<4x18x18xf32, #tpu.memory_space<vmem>>, vector<4x18x18xf32>,
    %c0_2 = arith.constant 0 : index
    %c0_3 = arith.constant 0 : index
    %c0_4 = arith.constant 0 : index
    %c0_5 = arith.constant 0 : index
    %2 = vector.load %arg1[%c0_2, %c0_3, %c0_4, %c0_5] : memref<1x4x16x16xf32, #tpu.memory_space<vmem>>, vector<1x4x16x16xf32>
    %3 = vector.shape_cast %2 : vector<1x4x16x16xf32> to vector<4x16x16xf32>
    %c0_6 = arith.constant 0 : index
    %c1 = arith.constant 1 : index
    %c1_7 = arith.constant 1 : index
    %4 = vector.load %arg6[%c0_6, %c1, %c1_7] : memref<4x18x18xf32, #tpu.memory_space<vmem>>, vector<4x16x16xf32>
    tpu.vector_store %arg6[%c0_6, %c1, %c1_7], %3 {strides = array<i32>} : memref<4x18x18xf32, #tpu.memory_space<vmem>>, vector<4x16x16xf32>,
    %c0_8 = arith.constant 0 : index
    %c0_9 = arith.constant 0 : index
    %c0_10 = arith.constant 0 : index
    %5 = vector.load %arg6[%c0_8, %c0_9, %c0_10] : memref<4x18x18xf32, #tpu.memory_space<vmem>>, vector<1x16x16xf32>
    %6 = vector.shape_cast %5 : vector<1x16x16xf32> to vector<16x16xf32>
    %c0_11 = arith.constant 0 : index
    %7 = memref.load %arg2[%c0_11] : memref<36xf32, #tpu.memory_space<smem>>
    %8 = vector.broadcast %7 : f32 to vector<16x16xf32>
    %9 = arith.mulf %6, %8 : vector<16x16xf32>
    %c0_12 = arith.constant 0 : index
    %c0_13 = arith.constant 0 : index
    %c1_14 = arith.constant 1 : index
    %10 = vector.load %arg6[%c0_12, %c0_13, %c1_14] : memref<4x18x18xf32, #tpu.memory_space<vmem>>, vector<1x16x16xf32>
    %11 = vector.shape_cast %10 : vector<1x16x16xf32> to vector<16x16xf32>
    %c1_15 = arith.constant 1 : index
    %12 = memref.load %arg2[%c1_15] : memref<36xf32, #tpu.memory_space<smem>>
    %13 = vector.broadcast %12 : f32 to vector<16x16xf32>
    %14 = arith.mulf %11, %13 : vector<16x16xf32>
    %15 = arith.addf %9, %14 : vector<16x16xf32>
    %c0_16 = arith.constant 0 : index
    %c0_17 = arith.constant 0 : index
    %c2 = arith.constant 2 : index
    %16 = vector.load %arg6[%c0_16, %c0_17, %c2] : memref<4x18x18xf32, #tpu.memory_space<vmem>>, vector<1x16x16xf32>
    %17 = vector.shape_cast %16 : vector<1x16x16xf32> to vector<16x16xf32>
    %c2_18 = arith.constant 2 : index
    %18 = memref.load %arg2[%c2_18] : memref<36xf32, #tpu.memory_space<smem>>
    %19 = vector.broadcast %18 : f32 to vector<16x16xf32>
    %20 = arith.mulf %17, %19 : vector<16x16xf32>
    %21 = arith.addf %15, %20 : vector<16x16xf32>
    %c0_19 = arith.constant 0 : index
    %c1_20 = arith.constant 1 : index
    %c0_21 = arith.constant 0 : index
    %22 = vector.load %arg6[%c0_19, %c1_20, %c0_21] : memref<4x18x18xf32, #tpu.memory_space<vmem>>, vector<1x16x16xf32>
    %23 = vector.shape_cast %22 : vector<1x16x16xf32> to vector<16x16xf32>
    %c3 = arith.constant 3 : index
    %24 = memref.load %arg2[%c3] : memref<36xf32, #tpu.memory_space<smem>>
    %25 = vector.broadcast %24 : f32 to vector<16x16xf32>
    %26 = arith.mulf %23, %25 : vector<16x16xf32>
    %27 = arith.addf %21, %26 : vector<16x16xf32>
    %c0_22 = arith.constant 0 : index
    %c1_23 = arith.constant 1 : index
    %c1_24 = arith.constant 1 : index
    %28 = vector.load %arg6[%c0_22, %c1_23, %c1_24] : memref<4x18x18xf32, #tpu.memory_space<vmem>>, vector<1x16x16xf32>
    %29 = vector.shape_cast %28 : vector<1x16x16xf32> to vector<16x16xf32>
    %c4 = arith.constant 4 : index
    %30 = memref.load %arg2[%c4] : memref<36xf32, #tpu.memory_space<smem>>
    %31 = vector.broadcast %30 : f32 to vector<16x16xf32>
    %32 = arith.mulf %29, %31 : vector<16x16xf32>
    %33 = arith.addf %27, %32 : vector<16x16xf32>
    %c0_25 = arith.constant 0 : index
    %c1_26 = arith.constant 1 : index
    %c2_27 = arith.constant 2 : index
    %34 = vector.load %arg6[%c0_25, %c1_26, %c2_27] : memref<4x18x18xf32, #tpu.memory_space<vmem>>, vector<1x16x16xf32>
    %35 = vector.shape_cast %34 : vector<1x16x16xf32> to vector<16x16xf32>
    %c5 = arith.constant 5 : index
    %36 = memref.load %arg2[%c5] : memref<36xf32, #tpu.memory_space<smem>>
    %37 = vector.broadcast %36 : f32 to vector<16x16xf32>
    %38 = arith.mulf %35, %37 : vector<16x16xf32>
    %39 = arith.addf %33, %38 : vector<16x16xf32>
    %c0_28 = arith.constant 0 : index
    %c2_29 = arith.constant 2 : index
    %c0_30 = arith.constant 0 : index
    %40 = vector.load %arg6[%c0_28, %c2_29, %c0_30] : memref<4x18x18xf32, #tpu.memory_space<vmem>>, vector<1x16x16xf32>
    %41 = vector.shape_cast %40 : vector<1x16x16xf32> to vector<16x16xf32>
    %c6 = arith.constant 6 : index
    %42 = memref.load %arg2[%c6] : memref<36xf32, #tpu.memory_space<smem>>
    %43 = vector.broadcast %42 : f32 to vector<16x16xf32>
    %44 = arith.mulf %41, %43 : vector<16x16xf32>
    %45 = arith.addf %39, %44 : vector<16x16xf32>
    %c0_31 = arith.constant 0 : index
    %c2_32 = arith.constant 2 : index
    %c1_33 = arith.constant 1 : index
    %46 = vector.load %arg6[%c0_31, %c2_32, %c1_33] : memref<4x18x18xf32, #tpu.memory_space<vmem>>, vector<1x16x16xf32>
    %47 = vector.shape_cast %46 : vector<1x16x16xf32> to vector<16x16xf32>
    %c7 = arith.constant 7 : index
    %48 = memref.load %arg2[%c7] : memref<36xf32, #tpu.memory_space<smem>>
    %49 = vector.broadcast %48 : f32 to vector<16x16xf32>
    %50 = arith.mulf %47, %49 : vector<16x16xf32>
    %51 = arith.addf %45, %50 : vector<16x16xf32>
    %c0_34 = arith.constant 0 : index
    %c2_35 = arith.constant 2 : index
    %c2_36 = arith.constant 2 : index
    %52 = vector.load %arg6[%c0_34, %c2_35, %c2_36] : memref<4x18x18xf32, #tpu.memory_space<vmem>>, vector<1x16x16xf32>
    %53 = vector.shape_cast %52 : vector<1x16x16xf32> to vector<16x16xf32>
    %c8 = arith.constant 8 : index
    %54 = memref.load %arg2[%c8] : memref<36xf32, #tpu.memory_space<smem>>
    %55 = vector.broadcast %54 : f32 to vector<16x16xf32>
    %56 = arith.mulf %53, %55 : vector<16x16xf32>
    %57 = arith.addf %51, %56 : vector<16x16xf32>
    %c0_37 = arith.constant 0 : index
    %58 = memref.load %arg3[%c0_37] : memref<32xf32, #tpu.memory_space<smem>>
    %59 = vector.broadcast %58 : f32 to vector<16x16xf32>
    %60 = arith.mulf %57, %59 : vector<16x16xf32>
    %c0_38 = arith.constant 0 : index
    %61 = memref.load %arg4[%c0_38] : memref<8xf32, #tpu.memory_space<smem>>
    %62 = vector.broadcast %61 : f32 to vector<16x16xf32>
    %63 = arith.addf %60, %62 : vector<16x16xf32>
    %c0_39 = arith.constant 0 : index
    %c0_40 = arith.constant 0 : index
    %c0_41 = arith.constant 0 : index
    %c0_42 = arith.constant 0 : index
    %64 = vector.load %arg5[%c0_39, %c0_40, %c0_41, %c0_42] : memref<1x8x16x16xf32, #tpu.memory_space<vmem>>, vector<1x1x16x16xf32>
    %65 = vector.shape_cast %64 : vector<1x1x16x16xf32> to vector<16x16xf32>
    %66 = vector.shape_cast %63 : vector<16x16xf32> to vector<1x1x16x16xf32>
    tpu.vector_store %arg5[%c0_39, %c0_40, %c0_41, %c0_42], %66 {strides = array<i32>} : memref<1x8x16x16xf32, #tpu.memory_space<vmem>>, vector<1x1x16x16xf32>,
    %c4_43 = arith.constant 4 : index
    %67 = memref.load %arg3[%c4_43] : memref<32xf32, #tpu.memory_space<smem>>
    %68 = vector.broadcast %67 : f32 to vector<16x16xf32>
    %69 = arith.mulf %57, %68 : vector<16x16xf32>
    %c1_44 = arith.constant 1 : index
    %70 = memref.load %arg4[%c1_44] : memref<8xf32, #tpu.memory_space<smem>>
    %71 = vector.broadcast %70 : f32 to vector<16x16xf32>
    %72 = arith.addf %69, %71 : vector<16x16xf32>
    %c0_45 = arith.constant 0 : index
    %c1_46 = arith.constant 1 : index
    %c0_47 = arith.constant 0 : index
    %c0_48 = arith.constant 0 : index
    %73 = vector.load %arg5[%c0_45, %c1_46, %c0_47, %c0_48] : memref<1x8x16x16xf32, #tpu.memory_space<vmem>>, vector<1x1x16x16xf32>
    %74 = vector.shape_cast %73 : vector<1x1x16x16xf32> to vector<16x16xf32>
    %75 = vector.shape_cast %72 : vector<16x16xf32> to vector<1x1x16x16xf32>
    tpu.vector_store %arg5[%c0_45, %c1_46, %c0_47, %c0_48], %75 {strides = array<i32>} : memref<1x8x16x16xf32, #tpu.memory_space<vmem>>, vector<1x1x16x16xf32>,
    %c8_49 = arith.constant 8 : index
    %76 = memref.load %arg3[%c8_49] : memref<32xf32, #tpu.memory_space<smem>>
    %77 = vector.broadcast %76 : f32 to vector<16x16xf32>
    %78 = arith.mulf %57, %77 : vector<16x16xf32>
    %c2_50 = arith.constant 2 : index
    %79 = memref.load %arg4[%c2_50] : memref<8xf32, #tpu.memory_space<smem>>
    %80 = vector.broadcast %79 : f32 to vector<16x16xf32>
    %81 = arith.addf %78, %80 : vector<16x16xf32>
    %c0_51 = arith.constant 0 : index
    %c2_52 = arith.constant 2 : index
    %c0_53 = arith.constant 0 : index
    %c0_54 = arith.constant 0 : index
    %82 = vector.load %arg5[%c0_51, %c2_52, %c0_53, %c0_54] : memref<1x8x16x16xf32, #tpu.memory_space<vmem>>, vector<1x1x16x16xf32>
    %83 = vector.shape_cast %82 : vector<1x1x16x16xf32> to vector<16x16xf32>
    %84 = vector.shape_cast %81 : vector<16x16xf32> to vector<1x1x16x16xf32>
    tpu.vector_store %arg5[%c0_51, %c2_52, %c0_53, %c0_54], %84 {strides = array<i32>} : memref<1x8x16x16xf32, #tpu.memory_space<vmem>>, vector<1x1x16x16xf32>,
    %c12 = arith.constant 12 : index
    %85 = memref.load %arg3[%c12] : memref<32xf32, #tpu.memory_space<smem>>
    %86 = vector.broadcast %85 : f32 to vector<16x16xf32>
    %87 = arith.mulf %57, %86 : vector<16x16xf32>
    %c3_55 = arith.constant 3 : index
    %88 = memref.load %arg4[%c3_55] : memref<8xf32, #tpu.memory_space<smem>>
    %89 = vector.broadcast %88 : f32 to vector<16x16xf32>
    %90 = arith.addf %87, %89 : vector<16x16xf32>
    %c0_56 = arith.constant 0 : index
    %c3_57 = arith.constant 3 : index
    %c0_58 = arith.constant 0 : index
    %c0_59 = arith.constant 0 : index
    %91 = vector.load %arg5[%c0_56, %c3_57, %c0_58, %c0_59] : memref<1x8x16x16xf32, #tpu.memory_space<vmem>>, vector<1x1x16x16xf32>
    %92 = vector.shape_cast %91 : vector<1x1x16x16xf32> to vector<16x16xf32>
    %93 = vector.shape_cast %90 : vector<16x16xf32> to vector<1x1x16x16xf32>
    tpu.vector_store %arg5[%c0_56, %c3_57, %c0_58, %c0_59], %93 {strides = array<i32>} : memref<1x8x16x16xf32, #tpu.memory_space<vmem>>, vector<1x1x16x16xf32>,
    %c16 = arith.constant 16 : index
    %94 = memref.load %arg3[%c16] : memref<32xf32, #tpu.memory_space<smem>>
    %95 = vector.broadcast %94 : f32 to vector<16x16xf32>
    %96 = arith.mulf %57, %95 : vector<16x16xf32>
    %c4_60 = arith.constant 4 : index
    %97 = memref.load %arg4[%c4_60] : memref<8xf32, #tpu.memory_space<smem>>
    %98 = vector.broadcast %97 : f32 to vector<16x16xf32>
    %99 = arith.addf %96, %98 : vector<16x16xf32>
    %c0_61 = arith.constant 0 : index
    %c4_62 = arith.constant 4 : index
    %c0_63 = arith.constant 0 : index
    %c0_64 = arith.constant 0 : index
    %100 = vector.load %arg5[%c0_61, %c4_62, %c0_63, %c0_64] : memref<1x8x16x16xf32, #tpu.memory_space<vmem>>, vector<1x1x16x16xf32>
    %101 = vector.shape_cast %100 : vector<1x1x16x16xf32> to vector<16x16xf32>
    %102 = vector.shape_cast %99 : vector<16x16xf32> to vector<1x1x16x16xf32>
    tpu.vector_store %arg5[%c0_61, %c4_62, %c0_63, %c0_64], %102 {strides = array<i32>} : memref<1x8x16x16xf32, #tpu.memory_space<vmem>>, vector<1x1x16x16xf32>,
    %c20 = arith.constant 20 : index
    %103 = memref.load %arg3[%c20] : memref<32xf32, #tpu.memory_space<smem>>
    %104 = vector.broadcast %103 : f32 to vector<16x16xf32>
    %105 = arith.mulf %57, %104 : vector<16x16xf32>
    %c5_65 = arith.constant 5 : index
    %106 = memref.load %arg4[%c5_65] : memref<8xf32, #tpu.memory_space<smem>>
    %107 = vector.broadcast %106 : f32 to vector<16x16xf32>
    %108 = arith.addf %105, %107 : vector<16x16xf32>
    %c0_66 = arith.constant 0 : index
    %c5_67 = arith.constant 5 : index
    %c0_68 = arith.constant 0 : index
    %c0_69 = arith.constant 0 : index
    %109 = vector.load %arg5[%c0_66, %c5_67, %c0_68, %c0_69] : memref<1x8x16x16xf32, #tpu.memory_space<vmem>>, vector<1x1x16x16xf32>
    %110 = vector.shape_cast %109 : vector<1x1x16x16xf32> to vector<16x16xf32>
    %111 = vector.shape_cast %108 : vector<16x16xf32> to vector<1x1x16x16xf32>
    tpu.vector_store %arg5[%c0_66, %c5_67, %c0_68, %c0_69], %111 {strides = array<i32>} : memref<1x8x16x16xf32, #tpu.memory_space<vmem>>, vector<1x1x16x16xf32>,
    %c24 = arith.constant 24 : index
    %112 = memref.load %arg3[%c24] : memref<32xf32, #tpu.memory_space<smem>>
    %113 = vector.broadcast %112 : f32 to vector<16x16xf32>
    %114 = arith.mulf %57, %113 : vector<16x16xf32>
    %c6_70 = arith.constant 6 : index
    %115 = memref.load %arg4[%c6_70] : memref<8xf32, #tpu.memory_space<smem>>
    %116 = vector.broadcast %115 : f32 to vector<16x16xf32>
    %117 = arith.addf %114, %116 : vector<16x16xf32>
    %c0_71 = arith.constant 0 : index
    %c6_72 = arith.constant 6 : index
    %c0_73 = arith.constant 0 : index
    %c0_74 = arith.constant 0 : index
    %118 = vector.load %arg5[%c0_71, %c6_72, %c0_73, %c0_74] : memref<1x8x16x16xf32, #tpu.memory_space<vmem>>, vector<1x1x16x16xf32>
    %119 = vector.shape_cast %118 : vector<1x1x16x16xf32> to vector<16x16xf32>
    %120 = vector.shape_cast %117 : vector<16x16xf32> to vector<1x1x16x16xf32>
    tpu.vector_store %arg5[%c0_71, %c6_72, %c0_73, %c0_74], %120 {strides = array<i32>} : memref<1x8x16x16xf32, #tpu.memory_space<vmem>>, vector<1x1x16x16xf32>,
    %c28 = arith.constant 28 : index
    %121 = memref.load %arg3[%c28] : memref<32xf32, #tpu.memory_space<smem>>
    %122 = vector.broadcast %121 : f32 to vector<16x16xf32>
    %123 = arith.mulf %57, %122 : vector<16x16xf32>
    %c7_75 = arith.constant 7 : index
    %124 = memref.load %arg4[%c7_75] : memref<8xf32, #tpu.memory_space<smem>>
    %125 = vector.broadcast %124 : f32 to vector<16x16xf32>
    %126 = arith.addf %123, %125 : vector<16x16xf32>
    %c0_76 = arith.constant 0 : index
    %c7_77 = arith.constant 7 : index
    %c0_78 = arith.constant 0 : index
    %c0_79 = arith.constant 0 : index
    %127 = vector.load %arg5[%c0_76, %c7_77, %c0_78, %c0_79] : memref<1x8x16x16xf32, #tpu.memory_space<vmem>>, vector<1x1x16x16xf32>
    %128 = vector.shape_cast %127 : vector<1x1x16x16xf32> to vector<16x16xf32>
    %129 = vector.shape_cast %126 : vector<16x16xf32> to vector<1x1x16x16xf32>
    tpu.vector_store %arg5[%c0_76, %c7_77, %c0_78, %c0_79], %129 {strides = array<i32>} : memref<1x8x16x16xf32, #tpu.memory_space<vmem>>, vector<1x1x16x16xf32>,
    %c1_80 = arith.constant 1 : index
    %c0_81 = arith.constant 0 : index
    %c0_82 = arith.constant 0 : index
    %130 = vector.load %arg6[%c1_80, %c0_81, %c0_82] : memref<4x18x18xf32, #tpu.memory_space<vmem>>, vector<1x16x16xf32>
    %131 = vector.shape_cast %130 : vector<1x16x16xf32> to vector<16x16xf32>
    %c9 = arith.constant 9 : index
    %132 = memref.load %arg2[%c9] : memref<36xf32, #tpu.memory_space<smem>>
    %133 = vector.broadcast %132 : f32 to vector<16x16xf32>
    %134 = arith.mulf %131, %133 : vector<16x16xf32>
    %c1_83 = arith.constant 1 : index
    %c0_84 = arith.constant 0 : index
    %c1_85 = arith.constant 1 : index
    %135 = vector.load %arg6[%c1_83, %c0_84, %c1_85] : memref<4x18x18xf32, #tpu.memory_space<vmem>>, vector<1x16x16xf32>
    %136 = vector.shape_cast %135 : vector<1x16x16xf32> to vector<16x16xf32>
    %c10 = arith.constant 10 : index
    %137 = memref.load %arg2[%c10] : memref<36xf32, #tpu.memory_space<smem>>
    %138 = vector.broadcast %137 : f32 to vector<16x16xf32>
    %139 = arith.mulf %136, %138 : vector<16x16xf32>
    %140 = arith.addf %134, %139 : vector<16x16xf32>
    %c1_86 = arith.constant 1 : index
    %c0_87 = arith.constant 0 : index
    %c2_88 = arith.constant 2 : index
    %141 = vector.load %arg6[%c1_86, %c0_87, %c2_88] : memref<4x18x18xf32, #tpu.memory_space<vmem>>, vector<1x16x16xf32>
    %142 = vector.shape_cast %141 : vector<1x16x16xf32> to vector<16x16xf32>
    %c11 = arith.constant 11 : index
    %143 = memref.load %arg2[%c11] : memref<36xf32, #tpu.memory_space<smem>>
    %144 = vector.broadcast %143 : f32 to vector<16x16xf32>
    %145 = arith.mulf %142, %144 : vector<16x16xf32>
    %146 = arith.addf %140, %145 : vector<16x16xf32>
    %c1_89 = arith.constant 1 : index
    %c1_90 = arith.constant 1 : index
    %c0_91 = arith.constant 0 : index
    %147 = vector.load %arg6[%c1_89, %c1_90, %c0_91] : memref<4x18x18xf32, #tpu.memory_space<vmem>>, vector<1x16x16xf32>
    %148 = vector.shape_cast %147 : vector<1x16x16xf32> to vector<16x16xf32>
    %c12_92 = arith.constant 12 : index
    %149 = memref.load %arg2[%c12_92] : memref<36xf32, #tpu.memory_space<smem>>
    %150 = vector.broadcast %149 : f32 to vector<16x16xf32>
    %151 = arith.mulf %148, %150 : vector<16x16xf32>
    %152 = arith.addf %146, %151 : vector<16x16xf32>
    %c1_93 = arith.constant 1 : index
    %c1_94 = arith.constant 1 : index
    %c1_95 = arith.constant 1 : index
    %153 = vector.load %arg6[%c1_93, %c1_94, %c1_95] : memref<4x18x18xf32, #tpu.memory_space<vmem>>, vector<1x16x16xf32>
    %154 = vector.shape_cast %153 : vector<1x16x16xf32> to vector<16x16xf32>
    %c13 = arith.constant 13 : index
    %155 = memref.load %arg2[%c13] : memref<36xf32, #tpu.memory_space<smem>>
    %156 = vector.broadcast %155 : f32 to vector<16x16xf32>
    %157 = arith.mulf %154, %156 : vector<16x16xf32>
    %158 = arith.addf %152, %157 : vector<16x16xf32>
    %c1_96 = arith.constant 1 : index
    %c1_97 = arith.constant 1 : index
    %c2_98 = arith.constant 2 : index
    %159 = vector.load %arg6[%c1_96, %c1_97, %c2_98] : memref<4x18x18xf32, #tpu.memory_space<vmem>>, vector<1x16x16xf32>
    %160 = vector.shape_cast %159 : vector<1x16x16xf32> to vector<16x16xf32>
    %c14 = arith.constant 14 : index
    %161 = memref.load %arg2[%c14] : memref<36xf32, #tpu.memory_space<smem>>
    %162 = vector.broadcast %161 : f32 to vector<16x16xf32>
    %163 = arith.mulf %160, %162 : vector<16x16xf32>
    %164 = arith.addf %158, %163 : vector<16x16xf32>
    %c1_99 = arith.constant 1 : index
    %c2_100 = arith.constant 2 : index
    %c0_101 = arith.constant 0 : index
    %165 = vector.load %arg6[%c1_99, %c2_100, %c0_101] : memref<4x18x18xf32, #tpu.memory_space<vmem>>, vector<1x16x16xf32>
    %166 = vector.shape_cast %165 : vector<1x16x16xf32> to vector<16x16xf32>
    %c15 = arith.constant 15 : index
    %167 = memref.load %arg2[%c15] : memref<36xf32, #tpu.memory_space<smem>>
    %168 = vector.broadcast %167 : f32 to vector<16x16xf32>
    %169 = arith.mulf %166, %168 : vector<16x16xf32>
    %170 = arith.addf %164, %169 : vector<16x16xf32>
    %c1_102 = arith.constant 1 : index
    %c2_103 = arith.constant 2 : index
    %c1_104 = arith.constant 1 : index
    %171 = vector.load %arg6[%c1_102, %c2_103, %c1_104] : memref<4x18x18xf32, #tpu.memory_space<vmem>>, vector<1x16x16xf32>
    %172 = vector.shape_cast %171 : vector<1x16x16xf32> to vector<16x16xf32>
    %c16_105 = arith.constant 16 : index
    %173 = memref.load %arg2[%c16_105] : memref<36xf32, #tpu.memory_space<smem>>
    %174 = vector.broadcast %173 : f32 to vector<16x16xf32>
    %175 = arith.mulf %172, %174 : vector<16x16xf32>
    %176 = arith.addf %170, %175 : vector<16x16xf32>
    %c1_106 = arith.constant 1 : index
    %c2_107 = arith.constant 2 : index
    %c2_108 = arith.constant 2 : index
    %177 = vector.load %arg6[%c1_106, %c2_107, %c2_108] : memref<4x18x18xf32, #tpu.memory_space<vmem>>, vector<1x16x16xf32>
    %178 = vector.shape_cast %177 : vector<1x16x16xf32> to vector<16x16xf32>
    %c17 = arith.constant 17 : index
    %179 = memref.load %arg2[%c17] : memref<36xf32, #tpu.memory_space<smem>>
    %180 = vector.broadcast %179 : f32 to vector<16x16xf32>
    %181 = arith.mulf %178, %180 : vector<16x16xf32>
    %182 = arith.addf %176, %181 : vector<16x16xf32>
    %c1_109 = arith.constant 1 : index
    %183 = memref.load %arg3[%c1_109] : memref<32xf32, #tpu.memory_space<smem>>
    %c0_110 = arith.constant 0 : index
    %c0_111 = arith.constant 0 : index
    %c0_112 = arith.constant 0 : index
    %c0_113 = arith.constant 0 : index
    %184 = vector.load %arg5[%c0_110, %c0_111, %c0_112, %c0_113] : memref<1x8x16x16xf32, #tpu.memory_space<vmem>>, vector<1x1x16x16xf32>
    %185 = vector.shape_cast %184 : vector<1x1x16x16xf32> to vector<16x16xf32>
    %186 = vector.broadcast %183 : f32 to vector<16x16xf32>
    %187 = arith.mulf %182, %186 : vector<16x16xf32>
    %188 = arith.addf %185, %187 : vector<16x16xf32>
    %c0_114 = arith.constant 0 : index
    %c0_115 = arith.constant 0 : index
    %c0_116 = arith.constant 0 : index
    %c0_117 = arith.constant 0 : index
    %189 = vector.load %arg5[%c0_114, %c0_115, %c0_116, %c0_117] : memref<1x8x16x16xf32, #tpu.memory_space<vmem>>, vector<1x1x16x16xf32>
    %190 = vector.shape_cast %189 : vector<1x1x16x16xf32> to vector<16x16xf32>
    %191 = vector.shape_cast %188 : vector<16x16xf32> to vector<1x1x16x16xf32>
    tpu.vector_store %arg5[%c0_114, %c0_115, %c0_116, %c0_117], %191 {strides = array<i32>} : memref<1x8x16x16xf32, #tpu.memory_space<vmem>>, vector<1x1x16x16xf32>,
    %c5_118 = arith.constant 5 : index
    %192 = memref.load %arg3[%c5_118] : memref<32xf32, #tpu.memory_space<smem>>
    %c0_119 = arith.constant 0 : index
    %c1_120 = arith.constant 1 : index
    %c0_121 = arith.constant 0 : index
    %c0_122 = arith.constant 0 : index
    %193 = vector.load %arg5[%c0_119, %c1_120, %c0_121, %c0_122] : memref<1x8x16x16xf32, #tpu.memory_space<vmem>>, vector<1x1x16x16xf32>
    %194 = vector.shape_cast %193 : vector<1x1x16x16xf32> to vector<16x16xf32>
    %195 = vector.broadcast %192 : f32 to vector<16x16xf32>
    %196 = arith.mulf %182, %195 : vector<16x16xf32>
    %197 = arith.addf %194, %196 : vector<16x16xf32>
    %c0_123 = arith.constant 0 : index
    %c1_124 = arith.constant 1 : index
    %c0_125 = arith.constant 0 : index
    %c0_126 = arith.constant 0 : index
    %198 = vector.load %arg5[%c0_123, %c1_124, %c0_125, %c0_126] : memref<1x8x16x16xf32, #tpu.memory_space<vmem>>, vector<1x1x16x16xf32>
    %199 = vector.shape_cast %198 : vector<1x1x16x16xf32> to vector<16x16xf32>
    %200 = vector.shape_cast %197 : vector<16x16xf32> to vector<1x1x16x16xf32>
    tpu.vector_store %arg5[%c0_123, %c1_124, %c0_125, %c0_126], %200 {strides = array<i32>} : memref<1x8x16x16xf32, #tpu.memory_space<vmem>>, vector<1x1x16x16xf32>,
    %c9_127 = arith.constant 9 : index
    %201 = memref.load %arg3[%c9_127] : memref<32xf32, #tpu.memory_space<smem>>
    %c0_128 = arith.constant 0 : index
    %c2_129 = arith.constant 2 : index
    %c0_130 = arith.constant 0 : index
    %c0_131 = arith.constant 0 : index
    %202 = vector.load %arg5[%c0_128, %c2_129, %c0_130, %c0_131] : memref<1x8x16x16xf32, #tpu.memory_space<vmem>>, vector<1x1x16x16xf32>
    %203 = vector.shape_cast %202 : vector<1x1x16x16xf32> to vector<16x16xf32>
    %204 = vector.broadcast %201 : f32 to vector<16x16xf32>
    %205 = arith.mulf %182, %204 : vector<16x16xf32>
    %206 = arith.addf %203, %205 : vector<16x16xf32>
    %c0_132 = arith.constant 0 : index
    %c2_133 = arith.constant 2 : index
    %c0_134 = arith.constant 0 : index
    %c0_135 = arith.constant 0 : index
    %207 = vector.load %arg5[%c0_132, %c2_133, %c0_134, %c0_135] : memref<1x8x16x16xf32, #tpu.memory_space<vmem>>, vector<1x1x16x16xf32>
    %208 = vector.shape_cast %207 : vector<1x1x16x16xf32> to vector<16x16xf32>
    %209 = vector.shape_cast %206 : vector<16x16xf32> to vector<1x1x16x16xf32>
    tpu.vector_store %arg5[%c0_132, %c2_133, %c0_134, %c0_135], %209 {strides = array<i32>} : memref<1x8x16x16xf32, #tpu.memory_space<vmem>>, vector<1x1x16x16xf32>,
    %c13_136 = arith.constant 13 : index
    %210 = memref.load %arg3[%c13_136] : memref<32xf32, #tpu.memory_space<smem>>
    %c0_137 = arith.constant 0 : index
    %c3_138 = arith.constant 3 : index
    %c0_139 = arith.constant 0 : index
    %c0_140 = arith.constant 0 : index
    %211 = vector.load %arg5[%c0_137, %c3_138, %c0_139, %c0_140] : memref<1x8x16x16xf32, #tpu.memory_space<vmem>>, vector<1x1x16x16xf32>
    %212 = vector.shape_cast %211 : vector<1x1x16x16xf32> to vector<16x16xf32>
    %213 = vector.broadcast %210 : f32 to vector<16x16xf32>
    %214 = arith.mulf %182, %213 : vector<16x16xf32>
    %215 = arith.addf %212, %214 : vector<16x16xf32>
    %c0_141 = arith.constant 0 : index
    %c3_142 = arith.constant 3 : index
    %c0_143 = arith.constant 0 : index
    %c0_144 = arith.constant 0 : index
    %216 = vector.load %arg5[%c0_141, %c3_142, %c0_143, %c0_144] : memref<1x8x16x16xf32, #tpu.memory_space<vmem>>, vector<1x1x16x16xf32>
    %217 = vector.shape_cast %216 : vector<1x1x16x16xf32> to vector<16x16xf32>
    %218 = vector.shape_cast %215 : vector<16x16xf32> to vector<1x1x16x16xf32>
    tpu.vector_store %arg5[%c0_141, %c3_142, %c0_143, %c0_144], %218 {strides = array<i32>} : memref<1x8x16x16xf32, #tpu.memory_space<vmem>>, vector<1x1x16x16xf32>,
    %c17_145 = arith.constant 17 : index
    %219 = memref.load %arg3[%c17_145] : memref<32xf32, #tpu.memory_space<smem>>
    %c0_146 = arith.constant 0 : index
    %c4_147 = arith.constant 4 : index
    %c0_148 = arith.constant 0 : index
    %c0_149 = arith.constant 0 : index
    %220 = vector.load %arg5[%c0_146, %c4_147, %c0_148, %c0_149] : memref<1x8x16x16xf32, #tpu.memory_space<vmem>>, vector<1x1x16x16xf32>
    %221 = vector.shape_cast %220 : vector<1x1x16x16xf32> to vector<16x16xf32>
    %222 = vector.broadcast %219 : f32 to vector<16x16xf32>
    %223 = arith.mulf %182, %222 : vector<16x16xf32>
    %224 = arith.addf %221, %223 : vector<16x16xf32>
    %c0_150 = arith.constant 0 : index
    %c4_151 = arith.constant 4 : index
    %c0_152 = arith.constant 0 : index
    %c0_153 = arith.constant 0 : index
    %225 = vector.load %arg5[%c0_150, %c4_151, %c0_152, %c0_153] : memref<1x8x16x16xf32, #tpu.memory_space<vmem>>, vector<1x1x16x16xf32>
    %226 = vector.shape_cast %225 : vector<1x1x16x16xf32> to vector<16x16xf32>
    %227 = vector.shape_cast %224 : vector<16x16xf32> to vector<1x1x16x16xf32>
    tpu.vector_store %arg5[%c0_150, %c4_151, %c0_152, %c0_153], %227 {strides = array<i32>} : memref<1x8x16x16xf32, #tpu.memory_space<vmem>>, vector<1x1x16x16xf32>,
    %c21 = arith.constant 21 : index
    %228 = memref.load %arg3[%c21] : memref<32xf32, #tpu.memory_space<smem>>
    %c0_154 = arith.constant 0 : index
    %c5_155 = arith.constant 5 : index
    %c0_156 = arith.constant 0 : index
    %c0_157 = arith.constant 0 : index
    %229 = vector.load %arg5[%c0_154, %c5_155, %c0_156, %c0_157] : memref<1x8x16x16xf32, #tpu.memory_space<vmem>>, vector<1x1x16x16xf32>
    %230 = vector.shape_cast %229 : vector<1x1x16x16xf32> to vector<16x16xf32>
    %231 = vector.broadcast %228 : f32 to vector<16x16xf32>
    %232 = arith.mulf %182, %231 : vector<16x16xf32>
    %233 = arith.addf %230, %232 : vector<16x16xf32>
    %c0_158 = arith.constant 0 : index
    %c5_159 = arith.constant 5 : index
    %c0_160 = arith.constant 0 : index
    %c0_161 = arith.constant 0 : index
    %234 = vector.load %arg5[%c0_158, %c5_159, %c0_160, %c0_161] : memref<1x8x16x16xf32, #tpu.memory_space<vmem>>, vector<1x1x16x16xf32>
    %235 = vector.shape_cast %234 : vector<1x1x16x16xf32> to vector<16x16xf32>
    %236 = vector.shape_cast %233 : vector<16x16xf32> to vector<1x1x16x16xf32>
    tpu.vector_store %arg5[%c0_158, %c5_159, %c0_160, %c0_161], %236 {strides = array<i32>} : memref<1x8x16x16xf32, #tpu.memory_space<vmem>>, vector<1x1x16x16xf32>,
    %c25 = arith.constant 25 : index
    %237 = memref.load %arg3[%c25] : memref<32xf32, #tpu.memory_space<smem>>
    %c0_162 = arith.constant 0 : index
    %c6_163 = arith.constant 6 : index
    %c0_164 = arith.constant 0 : index
    %c0_165 = arith.constant 0 : index
    %238 = vector.load %arg5[%c0_162, %c6_163, %c0_164, %c0_165] : memref<1x8x16x16xf32, #tpu.memory_space<vmem>>, vector<1x1x16x16xf32>
    %239 = vector.shape_cast %238 : vector<1x1x16x16xf32> to vector<16x16xf32>
    %240 = vector.broadcast %237 : f32 to vector<16x16xf32>
    %241 = arith.mulf %182, %240 : vector<16x16xf32>
    %242 = arith.addf %239, %241 : vector<16x16xf32>
    %c0_166 = arith.constant 0 : index
    %c6_167 = arith.constant 6 : index
    %c0_168 = arith.constant 0 : index
    %c0_169 = arith.constant 0 : index
    %243 = vector.load %arg5[%c0_166, %c6_167, %c0_168, %c0_169] : memref<1x8x16x16xf32, #tpu.memory_space<vmem>>, vector<1x1x16x16xf32>
    %244 = vector.shape_cast %243 : vector<1x1x16x16xf32> to vector<16x16xf32>
    %245 = vector.shape_cast %242 : vector<16x16xf32> to vector<1x1x16x16xf32>
    tpu.vector_store %arg5[%c0_166, %c6_167, %c0_168, %c0_169], %245 {strides = array<i32>} : memref<1x8x16x16xf32, #tpu.memory_space<vmem>>, vector<1x1x16x16xf32>,
    %c29 = arith.constant 29 : index
    %246 = memref.load %arg3[%c29] : memref<32xf32, #tpu.memory_space<smem>>
    %c0_170 = arith.constant 0 : index
    %c7_171 = arith.constant 7 : index
    %c0_172 = arith.constant 0 : index
    %c0_173 = arith.constant 0 : index
    %247 = vector.load %arg5[%c0_170, %c7_171, %c0_172, %c0_173] : memref<1x8x16x16xf32, #tpu.memory_space<vmem>>, vector<1x1x16x16xf32>
    %248 = vector.shape_cast %247 : vector<1x1x16x16xf32> to vector<16x16xf32>
    %249 = vector.broadcast %246 : f32 to vector<16x16xf32>
    %250 = arith.mulf %182, %249 : vector<16x16xf32>
    %251 = arith.addf %248, %250 : vector<16x16xf32>
    %c0_174 = arith.constant 0 : index
    %c7_175 = arith.constant 7 : index
    %c0_176 = arith.constant 0 : index
    %c0_177 = arith.constant 0 : index
    %252 = vector.load %arg5[%c0_174, %c7_175, %c0_176, %c0_177] : memref<1x8x16x16xf32, #tpu.memory_space<vmem>>, vector<1x1x16x16xf32>
    %253 = vector.shape_cast %252 : vector<1x1x16x16xf32> to vector<16x16xf32>
    %254 = vector.shape_cast %251 : vector<16x16xf32> to vector<1x1x16x16xf32>
    tpu.vector_store %arg5[%c0_174, %c7_175, %c0_176, %c0_177], %254 {strides = array<i32>} : memref<1x8x16x16xf32, #tpu.memory_space<vmem>>, vector<1x1x16x16xf32>,
    %c2_178 = arith.constant 2 : index
    %c0_179 = arith.constant 0 : index
    %c0_180 = arith.constant 0 : index
    %255 = vector.load %arg6[%c2_178, %c0_179, %c0_180] : memref<4x18x18xf32, #tpu.memory_space<vmem>>, vector<1x16x16xf32>
    %256 = vector.shape_cast %255 : vector<1x16x16xf32> to vector<16x16xf32>
    %c18 = arith.constant 18 : index
    %257 = memref.load %arg2[%c18] : memref<36xf32, #tpu.memory_space<smem>>
    %258 = vector.broadcast %257 : f32 to vector<16x16xf32>
    %259 = arith.mulf %256, %258 : vector<16x16xf32>
    %c2_181 = arith.constant 2 : index
    %c0_182 = arith.constant 0 : index
    %c1_183 = arith.constant 1 : index
    %260 = vector.load %arg6[%c2_181, %c0_182, %c1_183] : memref<4x18x18xf32, #tpu.memory_space<vmem>>, vector<1x16x16xf32>
    %261 = vector.shape_cast %260 : vector<1x16x16xf32> to vector<16x16xf32>
    %c19 = arith.constant 19 : index
    %262 = memref.load %arg2[%c19] : memref<36xf32, #tpu.memory_space<smem>>
    %263 = vector.broadcast %262 : f32 to vector<16x16xf32>
    %264 = arith.mulf %261, %263 : vector<16x16xf32>
    %265 = arith.addf %259, %264 : vector<16x16xf32>
    %c2_184 = arith.constant 2 : index
    %c0_185 = arith.constant 0 : index
    %c2_186 = arith.constant 2 : index
    %266 = vector.load %arg6[%c2_184, %c0_185, %c2_186] : memref<4x18x18xf32, #tpu.memory_space<vmem>>, vector<1x16x16xf32>
    %267 = vector.shape_cast %266 : vector<1x16x16xf32> to vector<16x16xf32>
    %c20_187 = arith.constant 20 : index
    %268 = memref.load %arg2[%c20_187] : memref<36xf32, #tpu.memory_space<smem>>
    %269 = vector.broadcast %268 : f32 to vector<16x16xf32>
    %270 = arith.mulf %267, %269 : vector<16x16xf32>
    %271 = arith.addf %265, %270 : vector<16x16xf32>
    %c2_188 = arith.constant 2 : index
    %c1_189 = arith.constant 1 : index
    %c0_190 = arith.constant 0 : index
    %272 = vector.load %arg6[%c2_188, %c1_189, %c0_190] : memref<4x18x18xf32, #tpu.memory_space<vmem>>, vector<1x16x16xf32>
    %273 = vector.shape_cast %272 : vector<1x16x16xf32> to vector<16x16xf32>
    %c21_191 = arith.constant 21 : index
    %274 = memref.load %arg2[%c21_191] : memref<36xf32, #tpu.memory_space<smem>>
    %275 = vector.broadcast %274 : f32 to vector<16x16xf32>
    %276 = arith.mulf %273, %275 : vector<16x16xf32>
    %277 = arith.addf %271, %276 : vector<16x16xf32>
    %c2_192 = arith.constant 2 : index
    %c1_193 = arith.constant 1 : index
    %c1_194 = arith.constant 1 : index
    %278 = vector.load %arg6[%c2_192, %c1_193, %c1_194] : memref<4x18x18xf32, #tpu.memory_space<vmem>>, vector<1x16x16xf32>
    %279 = vector.shape_cast %278 : vector<1x16x16xf32> to vector<16x16xf32>
    %c22 = arith.constant 22 : index
    %280 = memref.load %arg2[%c22] : memref<36xf32, #tpu.memory_space<smem>>
    %281 = vector.broadcast %280 : f32 to vector<16x16xf32>
    %282 = arith.mulf %279, %281 : vector<16x16xf32>
    %283 = arith.addf %277, %282 : vector<16x16xf32>
    %c2_195 = arith.constant 2 : index
    %c1_196 = arith.constant 1 : index
    %c2_197 = arith.constant 2 : index
    %284 = vector.load %arg6[%c2_195, %c1_196, %c2_197] : memref<4x18x18xf32, #tpu.memory_space<vmem>>, vector<1x16x16xf32>
    %285 = vector.shape_cast %284 : vector<1x16x16xf32> to vector<16x16xf32>
    %c23 = arith.constant 23 : index
    %286 = memref.load %arg2[%c23] : memref<36xf32, #tpu.memory_space<smem>>
    %287 = vector.broadcast %286 : f32 to vector<16x16xf32>
    %288 = arith.mulf %285, %287 : vector<16x16xf32>
    %289 = arith.addf %283, %288 : vector<16x16xf32>
    %c2_198 = arith.constant 2 : index
    %c2_199 = arith.constant 2 : index
    %c0_200 = arith.constant 0 : index
    %290 = vector.load %arg6[%c2_198, %c2_199, %c0_200] : memref<4x18x18xf32, #tpu.memory_space<vmem>>, vector<1x16x16xf32>
    %291 = vector.shape_cast %290 : vector<1x16x16xf32> to vector<16x16xf32>
    %c24_201 = arith.constant 24 : index
    %292 = memref.load %arg2[%c24_201] : memref<36xf32, #tpu.memory_space<smem>>
    %293 = vector.broadcast %292 : f32 to vector<16x16xf32>
    %294 = arith.mulf %291, %293 : vector<16x16xf32>
    %295 = arith.addf %289, %294 : vector<16x16xf32>
    %c2_202 = arith.constant 2 : index
    %c2_203 = arith.constant 2 : index
    %c1_204 = arith.constant 1 : index
    %296 = vector.load %arg6[%c2_202, %c2_203, %c1_204] : memref<4x18x18xf32, #tpu.memory_space<vmem>>, vector<1x16x16xf32>
    %297 = vector.shape_cast %296 : vector<1x16x16xf32> to vector<16x16xf32>
    %c25_205 = arith.constant 25 : index
    %298 = memref.load %arg2[%c25_205] : memref<36xf32, #tpu.memory_space<smem>>
    %299 = vector.broadcast %298 : f32 to vector<16x16xf32>
    %300 = arith.mulf %297, %299 : vector<16x16xf32>
    %301 = arith.addf %295, %300 : vector<16x16xf32>
    %c2_206 = arith.constant 2 : index
    %c2_207 = arith.constant 2 : index
    %c2_208 = arith.constant 2 : index
    %302 = vector.load %arg6[%c2_206, %c2_207, %c2_208] : memref<4x18x18xf32, #tpu.memory_space<vmem>>, vector<1x16x16xf32>
    %303 = vector.shape_cast %302 : vector<1x16x16xf32> to vector<16x16xf32>
    %c26 = arith.constant 26 : index
    %304 = memref.load %arg2[%c26] : memref<36xf32, #tpu.memory_space<smem>>
    %305 = vector.broadcast %304 : f32 to vector<16x16xf32>
    %306 = arith.mulf %303, %305 : vector<16x16xf32>
    %307 = arith.addf %301, %306 : vector<16x16xf32>
    %c2_209 = arith.constant 2 : index
    %308 = memref.load %arg3[%c2_209] : memref<32xf32, #tpu.memory_space<smem>>
    %c0_210 = arith.constant 0 : index
    %c0_211 = arith.constant 0 : index
    %c0_212 = arith.constant 0 : index
    %c0_213 = arith.constant 0 : index
    %309 = vector.load %arg5[%c0_210, %c0_211, %c0_212, %c0_213] : memref<1x8x16x16xf32, #tpu.memory_space<vmem>>, vector<1x1x16x16xf32>
    %310 = vector.shape_cast %309 : vector<1x1x16x16xf32> to vector<16x16xf32>
    %311 = vector.broadcast %308 : f32 to vector<16x16xf32>
    %312 = arith.mulf %307, %311 : vector<16x16xf32>
    %313 = arith.addf %310, %312 : vector<16x16xf32>
    %c0_214 = arith.constant 0 : index
    %c0_215 = arith.constant 0 : index
    %c0_216 = arith.constant 0 : index
    %c0_217 = arith.constant 0 : index
    %314 = vector.load %arg5[%c0_214, %c0_215, %c0_216, %c0_217] : memref<1x8x16x16xf32, #tpu.memory_space<vmem>>, vector<1x1x16x16xf32>
    %315 = vector.shape_cast %314 : vector<1x1x16x16xf32> to vector<16x16xf32>
    %316 = vector.shape_cast %313 : vector<16x16xf32> to vector<1x1x16x16xf32>
    tpu.vector_store %arg5[%c0_214, %c0_215, %c0_216, %c0_217], %316 {strides = array<i32>} : memref<1x8x16x16xf32, #tpu.memory_space<vmem>>, vector<1x1x16x16xf32>,
    %c6_218 = arith.constant 6 : index
    %317 = memref.load %arg3[%c6_218] : memref<32xf32, #tpu.memory_space<smem>>
    %c0_219 = arith.constant 0 : index
    %c1_220 = arith.constant 1 : index
    %c0_221 = arith.constant 0 : index
    %c0_222 = arith.constant 0 : index
    %318 = vector.load %arg5[%c0_219, %c1_220, %c0_221, %c0_222] : memref<1x8x16x16xf32, #tpu.memory_space<vmem>>, vector<1x1x16x16xf32>
    %319 = vector.shape_cast %318 : vector<1x1x16x16xf32> to vector<16x16xf32>
    %320 = vector.broadcast %317 : f32 to vector<16x16xf32>
    %321 = arith.mulf %307, %320 : vector<16x16xf32>
    %322 = arith.addf %319, %321 : vector<16x16xf32>
    %c0_223 = arith.constant 0 : index
    %c1_224 = arith.constant 1 : index
    %c0_225 = arith.constant 0 : index
    %c0_226 = arith.constant 0 : index
    %323 = vector.load %arg5[%c0_223, %c1_224, %c0_225, %c0_226] : memref<1x8x16x16xf32, #tpu.memory_space<vmem>>, vector<1x1x16x16xf32>
    %324 = vector.shape_cast %323 : vector<1x1x16x16xf32> to vector<16x16xf32>
    %325 = vector.shape_cast %322 : vector<16x16xf32> to vector<1x1x16x16xf32>
    tpu.vector_store %arg5[%c0_223, %c1_224, %c0_225, %c0_226], %325 {strides = array<i32>} : memref<1x8x16x16xf32, #tpu.memory_space<vmem>>, vector<1x1x16x16xf32>,
    %c10_227 = arith.constant 10 : index
    %326 = memref.load %arg3[%c10_227] : memref<32xf32, #tpu.memory_space<smem>>
    %c0_228 = arith.constant 0 : index
    %c2_229 = arith.constant 2 : index
    %c0_230 = arith.constant 0 : index
    %c0_231 = arith.constant 0 : index
    %327 = vector.load %arg5[%c0_228, %c2_229, %c0_230, %c0_231] : memref<1x8x16x16xf32, #tpu.memory_space<vmem>>, vector<1x1x16x16xf32>
    %328 = vector.shape_cast %327 : vector<1x1x16x16xf32> to vector<16x16xf32>
    %329 = vector.broadcast %326 : f32 to vector<16x16xf32>
    %330 = arith.mulf %307, %329 : vector<16x16xf32>
    %331 = arith.addf %328, %330 : vector<16x16xf32>
    %c0_232 = arith.constant 0 : index
    %c2_233 = arith.constant 2 : index
    %c0_234 = arith.constant 0 : index
    %c0_235 = arith.constant 0 : index
    %332 = vector.load %arg5[%c0_232, %c2_233, %c0_234, %c0_235] : memref<1x8x16x16xf32, #tpu.memory_space<vmem>>, vector<1x1x16x16xf32>
    %333 = vector.shape_cast %332 : vector<1x1x16x16xf32> to vector<16x16xf32>
    %334 = vector.shape_cast %331 : vector<16x16xf32> to vector<1x1x16x16xf32>
    tpu.vector_store %arg5[%c0_232, %c2_233, %c0_234, %c0_235], %334 {strides = array<i32>} : memref<1x8x16x16xf32, #tpu.memory_space<vmem>>, vector<1x1x16x16xf32>,
    %c14_236 = arith.constant 14 : index
    %335 = memref.load %arg3[%c14_236] : memref<32xf32, #tpu.memory_space<smem>>
    %c0_237 = arith.constant 0 : index
    %c3_238 = arith.constant 3 : index
    %c0_239 = arith.constant 0 : index
    %c0_240 = arith.constant 0 : index
    %336 = vector.load %arg5[%c0_237, %c3_238, %c0_239, %c0_240] : memref<1x8x16x16xf32, #tpu.memory_space<vmem>>, vector<1x1x16x16xf32>
    %337 = vector.shape_cast %336 : vector<1x1x16x16xf32> to vector<16x16xf32>
    %338 = vector.broadcast %335 : f32 to vector<16x16xf32>
    %339 = arith.mulf %307, %338 : vector<16x16xf32>
    %340 = arith.addf %337, %339 : vector<16x16xf32>
    %c0_241 = arith.constant 0 : index
    %c3_242 = arith.constant 3 : index
    %c0_243 = arith.constant 0 : index
    %c0_244 = arith.constant 0 : index
    %341 = vector.load %arg5[%c0_241, %c3_242, %c0_243, %c0_244] : memref<1x8x16x16xf32, #tpu.memory_space<vmem>>, vector<1x1x16x16xf32>
    %342 = vector.shape_cast %341 : vector<1x1x16x16xf32> to vector<16x16xf32>
    %343 = vector.shape_cast %340 : vector<16x16xf32> to vector<1x1x16x16xf32>
    tpu.vector_store %arg5[%c0_241, %c3_242, %c0_243, %c0_244], %343 {strides = array<i32>} : memref<1x8x16x16xf32, #tpu.memory_space<vmem>>, vector<1x1x16x16xf32>,
    %c18_245 = arith.constant 18 : index
    %344 = memref.load %arg3[%c18_245] : memref<32xf32, #tpu.memory_space<smem>>
    %c0_246 = arith.constant 0 : index
    %c4_247 = arith.constant 4 : index
    %c0_248 = arith.constant 0 : index
    %c0_249 = arith.constant 0 : index
    %345 = vector.load %arg5[%c0_246, %c4_247, %c0_248, %c0_249] : memref<1x8x16x16xf32, #tpu.memory_space<vmem>>, vector<1x1x16x16xf32>
    %346 = vector.shape_cast %345 : vector<1x1x16x16xf32> to vector<16x16xf32>
    %347 = vector.broadcast %344 : f32 to vector<16x16xf32>
    %348 = arith.mulf %307, %347 : vector<16x16xf32>
    %349 = arith.addf %346, %348 : vector<16x16xf32>
    %c0_250 = arith.constant 0 : index
    %c4_251 = arith.constant 4 : index
    %c0_252 = arith.constant 0 : index
    %c0_253 = arith.constant 0 : index
    %350 = vector.load %arg5[%c0_250, %c4_251, %c0_252, %c0_253] : memref<1x8x16x16xf32, #tpu.memory_space<vmem>>, vector<1x1x16x16xf32>
    %351 = vector.shape_cast %350 : vector<1x1x16x16xf32> to vector<16x16xf32>
    %352 = vector.shape_cast %349 : vector<16x16xf32> to vector<1x1x16x16xf32>
    tpu.vector_store %arg5[%c0_250, %c4_251, %c0_252, %c0_253], %352 {strides = array<i32>} : memref<1x8x16x16xf32, #tpu.memory_space<vmem>>, vector<1x1x16x16xf32>,
    %c22_254 = arith.constant 22 : index
    %353 = memref.load %arg3[%c22_254] : memref<32xf32, #tpu.memory_space<smem>>
    %c0_255 = arith.constant 0 : index
    %c5_256 = arith.constant 5 : index
    %c0_257 = arith.constant 0 : index
    %c0_258 = arith.constant 0 : index
    %354 = vector.load %arg5[%c0_255, %c5_256, %c0_257, %c0_258] : memref<1x8x16x16xf32, #tpu.memory_space<vmem>>, vector<1x1x16x16xf32>
    %355 = vector.shape_cast %354 : vector<1x1x16x16xf32> to vector<16x16xf32>
    %356 = vector.broadcast %353 : f32 to vector<16x16xf32>
    %357 = arith.mulf %307, %356 : vector<16x16xf32>
    %358 = arith.addf %355, %357 : vector<16x16xf32>
    %c0_259 = arith.constant 0 : index
    %c5_260 = arith.constant 5 : index
    %c0_261 = arith.constant 0 : index
    %c0_262 = arith.constant 0 : index
    %359 = vector.load %arg5[%c0_259, %c5_260, %c0_261, %c0_262] : memref<1x8x16x16xf32, #tpu.memory_space<vmem>>, vector<1x1x16x16xf32>
    %360 = vector.shape_cast %359 : vector<1x1x16x16xf32> to vector<16x16xf32>
    %361 = vector.shape_cast %358 : vector<16x16xf32> to vector<1x1x16x16xf32>
    tpu.vector_store %arg5[%c0_259, %c5_260, %c0_261, %c0_262], %361 {strides = array<i32>} : memref<1x8x16x16xf32, #tpu.memory_space<vmem>>, vector<1x1x16x16xf32>,
    %c26_263 = arith.constant 26 : index
    %362 = memref.load %arg3[%c26_263] : memref<32xf32, #tpu.memory_space<smem>>
    %c0_264 = arith.constant 0 : index
    %c6_265 = arith.constant 6 : index
    %c0_266 = arith.constant 0 : index
    %c0_267 = arith.constant 0 : index
    %363 = vector.load %arg5[%c0_264, %c6_265, %c0_266, %c0_267] : memref<1x8x16x16xf32, #tpu.memory_space<vmem>>, vector<1x1x16x16xf32>
    %364 = vector.shape_cast %363 : vector<1x1x16x16xf32> to vector<16x16xf32>
    %365 = vector.broadcast %362 : f32 to vector<16x16xf32>
    %366 = arith.mulf %307, %365 : vector<16x16xf32>
    %367 = arith.addf %364, %366 : vector<16x16xf32>
    %c0_268 = arith.constant 0 : index
    %c6_269 = arith.constant 6 : index
    %c0_270 = arith.constant 0 : index
    %c0_271 = arith.constant 0 : index
    %368 = vector.load %arg5[%c0_268, %c6_269, %c0_270, %c0_271] : memref<1x8x16x16xf32, #tpu.memory_space<vmem>>, vector<1x1x16x16xf32>
    %369 = vector.shape_cast %368 : vector<1x1x16x16xf32> to vector<16x16xf32>
    %370 = vector.shape_cast %367 : vector<16x16xf32> to vector<1x1x16x16xf32>
    tpu.vector_store %arg5[%c0_268, %c6_269, %c0_270, %c0_271], %370 {strides = array<i32>} : memref<1x8x16x16xf32, #tpu.memory_space<vmem>>, vector<1x1x16x16xf32>,
    %c30 = arith.constant 30 : index
    %371 = memref.load %arg3[%c30] : memref<32xf32, #tpu.memory_space<smem>>
    %c0_272 = arith.constant 0 : index
    %c7_273 = arith.constant 7 : index
    %c0_274 = arith.constant 0 : index
    %c0_275 = arith.constant 0 : index
    %372 = vector.load %arg5[%c0_272, %c7_273, %c0_274, %c0_275] : memref<1x8x16x16xf32, #tpu.memory_space<vmem>>, vector<1x1x16x16xf32>
    %373 = vector.shape_cast %372 : vector<1x1x16x16xf32> to vector<16x16xf32>
    %374 = vector.broadcast %371 : f32 to vector<16x16xf32>
    %375 = arith.mulf %307, %374 : vector<16x16xf32>
    %376 = arith.addf %373, %375 : vector<16x16xf32>
    %c0_276 = arith.constant 0 : index
    %c7_277 = arith.constant 7 : index
    %c0_278 = arith.constant 0 : index
    %c0_279 = arith.constant 0 : index
    %377 = vector.load %arg5[%c0_276, %c7_277, %c0_278, %c0_279] : memref<1x8x16x16xf32, #tpu.memory_space<vmem>>, vector<1x1x16x16xf32>
    %378 = vector.shape_cast %377 : vector<1x1x16x16xf32> to vector<16x16xf32>
    %379 = vector.shape_cast %376 : vector<16x16xf32> to vector<1x1x16x16xf32>
    tpu.vector_store %arg5[%c0_276, %c7_277, %c0_278, %c0_279], %379 {strides = array<i32>} : memref<1x8x16x16xf32, #tpu.memory_space<vmem>>, vector<1x1x16x16xf32>,
    %c3_280 = arith.constant 3 : index
    %c0_281 = arith.constant 0 : index
    %c0_282 = arith.constant 0 : index
    %380 = vector.load %arg6[%c3_280, %c0_281, %c0_282] : memref<4x18x18xf32, #tpu.memory_space<vmem>>, vector<1x16x16xf32>
    %381 = vector.shape_cast %380 : vector<1x16x16xf32> to vector<16x16xf32>
    %c27 = arith.constant 27 : index
    %382 = memref.load %arg2[%c27] : memref<36xf32, #tpu.memory_space<smem>>
    %383 = vector.broadcast %382 : f32 to vector<16x16xf32>
    %384 = arith.mulf %381, %383 : vector<16x16xf32>
    %c3_283 = arith.constant 3 : index
    %c0_284 = arith.constant 0 : index
    %c1_285 = arith.constant 1 : index
    %385 = vector.load %arg6[%c3_283, %c0_284, %c1_285] : memref<4x18x18xf32, #tpu.memory_space<vmem>>, vector<1x16x16xf32>
    %386 = vector.shape_cast %385 : vector<1x16x16xf32> to vector<16x16xf32>
    %c28_286 = arith.constant 28 : index
    %387 = memref.load %arg2[%c28_286] : memref<36xf32, #tpu.memory_space<smem>>
    %388 = vector.broadcast %387 : f32 to vector<16x16xf32>
    %389 = arith.mulf %386, %388 : vector<16x16xf32>
    %390 = arith.addf %384, %389 : vector<16x16xf32>
    %c3_287 = arith.constant 3 : index
    %c0_288 = arith.constant 0 : index
    %c2_289 = arith.constant 2 : index
    %391 = vector.load %arg6[%c3_287, %c0_288, %c2_289] : memref<4x18x18xf32, #tpu.memory_space<vmem>>, vector<1x16x16xf32>
    %392 = vector.shape_cast %391 : vector<1x16x16xf32> to vector<16x16xf32>
    %c29_290 = arith.constant 29 : index
    %393 = memref.load %arg2[%c29_290] : memref<36xf32, #tpu.memory_space<smem>>
    %394 = vector.broadcast %393 : f32 to vector<16x16xf32>
    %395 = arith.mulf %392, %394 : vector<16x16xf32>
    %396 = arith.addf %390, %395 : vector<16x16xf32>
    %c3_291 = arith.constant 3 : index
    %c1_292 = arith.constant 1 : index
    %c0_293 = arith.constant 0 : index
    %397 = vector.load %arg6[%c3_291, %c1_292, %c0_293] : memref<4x18x18xf32, #tpu.memory_space<vmem>>, vector<1x16x16xf32>
    %398 = vector.shape_cast %397 : vector<1x16x16xf32> to vector<16x16xf32>
    %c30_294 = arith.constant 30 : index
    %399 = memref.load %arg2[%c30_294] : memref<36xf32, #tpu.memory_space<smem>>
    %400 = vector.broadcast %399 : f32 to vector<16x16xf32>
    %401 = arith.mulf %398, %400 : vector<16x16xf32>
    %402 = arith.addf %396, %401 : vector<16x16xf32>
    %c3_295 = arith.constant 3 : index
    %c1_296 = arith.constant 1 : index
    %c1_297 = arith.constant 1 : index
    %403 = vector.load %arg6[%c3_295, %c1_296, %c1_297] : memref<4x18x18xf32, #tpu.memory_space<vmem>>, vector<1x16x16xf32>
    %404 = vector.shape_cast %403 : vector<1x16x16xf32> to vector<16x16xf32>
    %c31 = arith.constant 31 : index
    %405 = memref.load %arg2[%c31] : memref<36xf32, #tpu.memory_space<smem>>
    %406 = vector.broadcast %405 : f32 to vector<16x16xf32>
    %407 = arith.mulf %404, %406 : vector<16x16xf32>
    %408 = arith.addf %402, %407 : vector<16x16xf32>
    %c3_298 = arith.constant 3 : index
    %c1_299 = arith.constant 1 : index
    %c2_300 = arith.constant 2 : index
    %409 = vector.load %arg6[%c3_298, %c1_299, %c2_300] : memref<4x18x18xf32, #tpu.memory_space<vmem>>, vector<1x16x16xf32>
    %410 = vector.shape_cast %409 : vector<1x16x16xf32> to vector<16x16xf32>
    %c32 = arith.constant 32 : index
    %411 = memref.load %arg2[%c32] : memref<36xf32, #tpu.memory_space<smem>>
    %412 = vector.broadcast %411 : f32 to vector<16x16xf32>
    %413 = arith.mulf %410, %412 : vector<16x16xf32>
    %414 = arith.addf %408, %413 : vector<16x16xf32>
    %c3_301 = arith.constant 3 : index
    %c2_302 = arith.constant 2 : index
    %c0_303 = arith.constant 0 : index
    %415 = vector.load %arg6[%c3_301, %c2_302, %c0_303] : memref<4x18x18xf32, #tpu.memory_space<vmem>>, vector<1x16x16xf32>
    %416 = vector.shape_cast %415 : vector<1x16x16xf32> to vector<16x16xf32>
    %c33 = arith.constant 33 : index
    %417 = memref.load %arg2[%c33] : memref<36xf32, #tpu.memory_space<smem>>
    %418 = vector.broadcast %417 : f32 to vector<16x16xf32>
    %419 = arith.mulf %416, %418 : vector<16x16xf32>
    %420 = arith.addf %414, %419 : vector<16x16xf32>
    %c3_304 = arith.constant 3 : index
    %c2_305 = arith.constant 2 : index
    %c1_306 = arith.constant 1 : index
    %421 = vector.load %arg6[%c3_304, %c2_305, %c1_306] : memref<4x18x18xf32, #tpu.memory_space<vmem>>, vector<1x16x16xf32>
    %422 = vector.shape_cast %421 : vector<1x16x16xf32> to vector<16x16xf32>
    %c34 = arith.constant 34 : index
    %423 = memref.load %arg2[%c34] : memref<36xf32, #tpu.memory_space<smem>>
    %424 = vector.broadcast %423 : f32 to vector<16x16xf32>
    %425 = arith.mulf %422, %424 : vector<16x16xf32>
    %426 = arith.addf %420, %425 : vector<16x16xf32>
    %c3_307 = arith.constant 3 : index
    %c2_308 = arith.constant 2 : index
    %c2_309 = arith.constant 2 : index
    %427 = vector.load %arg6[%c3_307, %c2_308, %c2_309] : memref<4x18x18xf32, #tpu.memory_space<vmem>>, vector<1x16x16xf32>
    %428 = vector.shape_cast %427 : vector<1x16x16xf32> to vector<16x16xf32>
    %c35 = arith.constant 35 : index
    %429 = memref.load %arg2[%c35] : memref<36xf32, #tpu.memory_space<smem>>
    %430 = vector.broadcast %429 : f32 to vector<16x16xf32>
    %431 = arith.mulf %428, %430 : vector<16x16xf32>
    %432 = arith.addf %426, %431 : vector<16x16xf32>
    %c3_310 = arith.constant 3 : index
    %433 = memref.load %arg3[%c3_310] : memref<32xf32, #tpu.memory_space<smem>>
    %c0_311 = arith.constant 0 : index
    %c0_312 = arith.constant 0 : index
    %c0_313 = arith.constant 0 : index
    %c0_314 = arith.constant 0 : index
    %434 = vector.load %arg5[%c0_311, %c0_312, %c0_313, %c0_314] : memref<1x8x16x16xf32, #tpu.memory_space<vmem>>, vector<1x1x16x16xf32>
    %435 = vector.shape_cast %434 : vector<1x1x16x16xf32> to vector<16x16xf32>
    %436 = vector.broadcast %433 : f32 to vector<16x16xf32>
    %437 = arith.mulf %432, %436 : vector<16x16xf32>
    %438 = arith.addf %435, %437 : vector<16x16xf32>
    %c0_315 = arith.constant 0 : index
    %c0_316 = arith.constant 0 : index
    %c0_317 = arith.constant 0 : index
    %c0_318 = arith.constant 0 : index
    %439 = vector.load %arg5[%c0_315, %c0_316, %c0_317, %c0_318] : memref<1x8x16x16xf32, #tpu.memory_space<vmem>>, vector<1x1x16x16xf32>
    %440 = vector.shape_cast %439 : vector<1x1x16x16xf32> to vector<16x16xf32>
    %441 = vector.shape_cast %438 : vector<16x16xf32> to vector<1x1x16x16xf32>
    tpu.vector_store %arg5[%c0_315, %c0_316, %c0_317, %c0_318], %441 {strides = array<i32>} : memref<1x8x16x16xf32, #tpu.memory_space<vmem>>, vector<1x1x16x16xf32>,
    %c7_319 = arith.constant 7 : index
    %442 = memref.load %arg3[%c7_319] : memref<32xf32, #tpu.memory_space<smem>>
    %c0_320 = arith.constant 0 : index
    %c1_321 = arith.constant 1 : index
    %c0_322 = arith.constant 0 : index
    %c0_323 = arith.constant 0 : index
    %443 = vector.load %arg5[%c0_320, %c1_321, %c0_322, %c0_323] : memref<1x8x16x16xf32, #tpu.memory_space<vmem>>, vector<1x1x16x16xf32>
    %444 = vector.shape_cast %443 : vector<1x1x16x16xf32> to vector<16x16xf32>
    %445 = vector.broadcast %442 : f32 to vector<16x16xf32>
    %446 = arith.mulf %432, %445 : vector<16x16xf32>
    %447 = arith.addf %444, %446 : vector<16x16xf32>
    %c0_324 = arith.constant 0 : index
    %c1_325 = arith.constant 1 : index
    %c0_326 = arith.constant 0 : index
    %c0_327 = arith.constant 0 : index
    %448 = vector.load %arg5[%c0_324, %c1_325, %c0_326, %c0_327] : memref<1x8x16x16xf32, #tpu.memory_space<vmem>>, vector<1x1x16x16xf32>
    %449 = vector.shape_cast %448 : vector<1x1x16x16xf32> to vector<16x16xf32>
    %450 = vector.shape_cast %447 : vector<16x16xf32> to vector<1x1x16x16xf32>
    tpu.vector_store %arg5[%c0_324, %c1_325, %c0_326, %c0_327], %450 {strides = array<i32>} : memref<1x8x16x16xf32, #tpu.memory_space<vmem>>, vector<1x1x16x16xf32>,
    %c11_328 = arith.constant 11 : index
    %451 = memref.load %arg3[%c11_328] : memref<32xf32, #tpu.memory_space<smem>>
    %c0_329 = arith.constant 0 : index
    %c2_330 = arith.constant 2 : index
    %c0_331 = arith.constant 0 : index
    %c0_332 = arith.constant 0 : index
    %452 = vector.load %arg5[%c0_329, %c2_330, %c0_331, %c0_332] : memref<1x8x16x16xf32, #tpu.memory_space<vmem>>, vector<1x1x16x16xf32>
    %453 = vector.shape_cast %452 : vector<1x1x16x16xf32> to vector<16x16xf32>
    %454 = vector.broadcast %451 : f32 to vector<16x16xf32>
    %455 = arith.mulf %432, %454 : vector<16x16xf32>
    %456 = arith.addf %453, %455 : vector<16x16xf32>
    %c0_333 = arith.constant 0 : index
    %c2_334 = arith.constant 2 : index
    %c0_335 = arith.constant 0 : index
    %c0_336 = arith.constant 0 : index
    %457 = vector.load %arg5[%c0_333, %c2_334, %c0_335, %c0_336] : memref<1x8x16x16xf32, #tpu.memory_space<vmem>>, vector<1x1x16x16xf32>
    %458 = vector.shape_cast %457 : vector<1x1x16x16xf32> to vector<16x16xf32>
    %459 = vector.shape_cast %456 : vector<16x16xf32> to vector<1x1x16x16xf32>
    tpu.vector_store %arg5[%c0_333, %c2_334, %c0_335, %c0_336], %459 {strides = array<i32>} : memref<1x8x16x16xf32, #tpu.memory_space<vmem>>, vector<1x1x16x16xf32>,
    %c15_337 = arith.constant 15 : index
    %460 = memref.load %arg3[%c15_337] : memref<32xf32, #tpu.memory_space<smem>>
    %c0_338 = arith.constant 0 : index
    %c3_339 = arith.constant 3 : index
    %c0_340 = arith.constant 0 : index
    %c0_341 = arith.constant 0 : index
    %461 = vector.load %arg5[%c0_338, %c3_339, %c0_340, %c0_341] : memref<1x8x16x16xf32, #tpu.memory_space<vmem>>, vector<1x1x16x16xf32>
    %462 = vector.shape_cast %461 : vector<1x1x16x16xf32> to vector<16x16xf32>
    %463 = vector.broadcast %460 : f32 to vector<16x16xf32>
    %464 = arith.mulf %432, %463 : vector<16x16xf32>
    %465 = arith.addf %462, %464 : vector<16x16xf32>
    %c0_342 = arith.constant 0 : index
    %c3_343 = arith.constant 3 : index
    %c0_344 = arith.constant 0 : index
    %c0_345 = arith.constant 0 : index
    %466 = vector.load %arg5[%c0_342, %c3_343, %c0_344, %c0_345] : memref<1x8x16x16xf32, #tpu.memory_space<vmem>>, vector<1x1x16x16xf32>
    %467 = vector.shape_cast %466 : vector<1x1x16x16xf32> to vector<16x16xf32>
    %468 = vector.shape_cast %465 : vector<16x16xf32> to vector<1x1x16x16xf32>
    tpu.vector_store %arg5[%c0_342, %c3_343, %c0_344, %c0_345], %468 {strides = array<i32>} : memref<1x8x16x16xf32, #tpu.memory_space<vmem>>, vector<1x1x16x16xf32>,
    %c19_346 = arith.constant 19 : index
    %469 = memref.load %arg3[%c19_346] : memref<32xf32, #tpu.memory_space<smem>>
    %c0_347 = arith.constant 0 : index
    %c4_348 = arith.constant 4 : index
    %c0_349 = arith.constant 0 : index
    %c0_350 = arith.constant 0 : index
    %470 = vector.load %arg5[%c0_347, %c4_348, %c0_349, %c0_350] : memref<1x8x16x16xf32, #tpu.memory_space<vmem>>, vector<1x1x16x16xf32>
    %471 = vector.shape_cast %470 : vector<1x1x16x16xf32> to vector<16x16xf32>
    %472 = vector.broadcast %469 : f32 to vector<16x16xf32>
    %473 = arith.mulf %432, %472 : vector<16x16xf32>
    %474 = arith.addf %471, %473 : vector<16x16xf32>
    %c0_351 = arith.constant 0 : index
    %c4_352 = arith.constant 4 : index
    %c0_353 = arith.constant 0 : index
    %c0_354 = arith.constant 0 : index
    %475 = vector.load %arg5[%c0_351, %c4_352, %c0_353, %c0_354] : memref<1x8x16x16xf32, #tpu.memory_space<vmem>>, vector<1x1x16x16xf32>
    %476 = vector.shape_cast %475 : vector<1x1x16x16xf32> to vector<16x16xf32>
    %477 = vector.shape_cast %474 : vector<16x16xf32> to vector<1x1x16x16xf32>
    tpu.vector_store %arg5[%c0_351, %c4_352, %c0_353, %c0_354], %477 {strides = array<i32>} : memref<1x8x16x16xf32, #tpu.memory_space<vmem>>, vector<1x1x16x16xf32>,
    %c23_355 = arith.constant 23 : index
    %478 = memref.load %arg3[%c23_355] : memref<32xf32, #tpu.memory_space<smem>>
    %c0_356 = arith.constant 0 : index
    %c5_357 = arith.constant 5 : index
    %c0_358 = arith.constant 0 : index
    %c0_359 = arith.constant 0 : index
    %479 = vector.load %arg5[%c0_356, %c5_357, %c0_358, %c0_359] : memref<1x8x16x16xf32, #tpu.memory_space<vmem>>, vector<1x1x16x16xf32>
    %480 = vector.shape_cast %479 : vector<1x1x16x16xf32> to vector<16x16xf32>
    %481 = vector.broadcast %478 : f32 to vector<16x16xf32>
    %482 = arith.mulf %432, %481 : vector<16x16xf32>
    %483 = arith.addf %480, %482 : vector<16x16xf32>
    %c0_360 = arith.constant 0 : index
    %c5_361 = arith.constant 5 : index
    %c0_362 = arith.constant 0 : index
    %c0_363 = arith.constant 0 : index
    %484 = vector.load %arg5[%c0_360, %c5_361, %c0_362, %c0_363] : memref<1x8x16x16xf32, #tpu.memory_space<vmem>>, vector<1x1x16x16xf32>
    %485 = vector.shape_cast %484 : vector<1x1x16x16xf32> to vector<16x16xf32>
    %486 = vector.shape_cast %483 : vector<16x16xf32> to vector<1x1x16x16xf32>
    tpu.vector_store %arg5[%c0_360, %c5_361, %c0_362, %c0_363], %486 {strides = array<i32>} : memref<1x8x16x16xf32, #tpu.memory_space<vmem>>, vector<1x1x16x16xf32>,
    %c27_364 = arith.constant 27 : index
    %487 = memref.load %arg3[%c27_364] : memref<32xf32, #tpu.memory_space<smem>>
    %c0_365 = arith.constant 0 : index
    %c6_366 = arith.constant 6 : index
    %c0_367 = arith.constant 0 : index
    %c0_368 = arith.constant 0 : index
    %488 = vector.load %arg5[%c0_365, %c6_366, %c0_367, %c0_368] : memref<1x8x16x16xf32, #tpu.memory_space<vmem>>, vector<1x1x16x16xf32>
    %489 = vector.shape_cast %488 : vector<1x1x16x16xf32> to vector<16x16xf32>
    %490 = vector.broadcast %487 : f32 to vector<16x16xf32>
    %491 = arith.mulf %432, %490 : vector<16x16xf32>
    %492 = arith.addf %489, %491 : vector<16x16xf32>
    %c0_369 = arith.constant 0 : index
    %c6_370 = arith.constant 6 : index
    %c0_371 = arith.constant 0 : index
    %c0_372 = arith.constant 0 : index
    %493 = vector.load %arg5[%c0_369, %c6_370, %c0_371, %c0_372] : memref<1x8x16x16xf32, #tpu.memory_space<vmem>>, vector<1x1x16x16xf32>
    %494 = vector.shape_cast %493 : vector<1x1x16x16xf32> to vector<16x16xf32>
    %495 = vector.shape_cast %492 : vector<16x16xf32> to vector<1x1x16x16xf32>
    tpu.vector_store %arg5[%c0_369, %c6_370, %c0_371, %c0_372], %495 {strides = array<i32>} : memref<1x8x16x16xf32, #tpu.memory_space<vmem>>, vector<1x1x16x16xf32>,
    %c31_373 = arith.constant 31 : index
    %496 = memref.load %arg3[%c31_373] : memref<32xf32, #tpu.memory_space<smem>>
    %c0_374 = arith.constant 0 : index
    %c7_375 = arith.constant 7 : index
    %c0_376 = arith.constant 0 : index
    %c0_377 = arith.constant 0 : index
    %497 = vector.load %arg5[%c0_374, %c7_375, %c0_376, %c0_377] : memref<1x8x16x16xf32, #tpu.memory_space<vmem>>, vector<1x1x16x16xf32>
    %498 = vector.shape_cast %497 : vector<1x1x16x16xf32> to vector<16x16xf32>
    %499 = vector.broadcast %496 : f32 to vector<16x16xf32>
    %500 = arith.mulf %432, %499 : vector<16x16xf32>
    %501 = arith.addf %498, %500 : vector<16x16xf32>
    %c0_378 = arith.constant 0 : index
    %c7_379 = arith.constant 7 : index
    %c0_380 = arith.constant 0 : index
    %c0_381 = arith.constant 0 : index
    %502 = vector.load %arg5[%c0_378, %c7_379, %c0_380, %c0_381] : memref<1x8x16x16xf32, #tpu.memory_space<vmem>>, vector<1x1x16x16xf32>
    %503 = vector.shape_cast %502 : vector<1x1x16x16xf32> to vector<16x16xf32>
    %504 = vector.shape_cast %501 : vector<16x16xf32> to vector<1x1x16x16xf32>
    tpu.vector_store %arg5[%c0_378, %c7_379, %c0_380, %c0_381], %504 {strides = array<i32>} : memref<1x8x16x16xf32, #tpu.memory_space<vmem>>, vector<1x1x16x16xf32>,
    return
  }
  func.func @transform_0(%arg0: i32) -> (i32, i32, i32, i32) {
    %c0_i32 = arith.constant 0 : i32
    %c0_i32_0 = arith.constant 0 : i32
    %c0_i32_1 = arith.constant 0 : i32
    %c0_i32_2 = arith.constant 0 : i32
    return %arg0, %c0_i32, %c0_i32_0, %c0_i32_1 : i32, i32, i32, i32
  }
  func.func @transform_1(%arg0: i32) -> i32 {
    %c0_i32 = arith.constant 0 : i32
    %c0_i32_0 = arith.constant 0 : i32
    return %c0_i32 : i32
  }
  func.func @transform_2(%arg0: i32) -> i32 {
    %c0_i32 = arith.constant 0 : i32
    %c0_i32_0 = arith.constant 0 : i32
    return %c0_i32 : i32
  }
  func.func @transform_3(%arg0: i32) -> i32 {
    %c0_i32 = arith.constant 0 : i32
    %c0_i32_0 = arith.constant 0 : i32
    return %c0_i32 : i32
  }
  func.func @transform_4(%arg0: i32) -> (i32, i32, i32, i32) {
    %c0_i32 = arith.constant 0 : i32
    %c0_i32_0 = arith.constant 0 : i32
    %c0_i32_1 = arith.constant 0 : i32
    %c0_i32_2 = arith.constant 0 : i32
    return %arg0, %c0_i32, %c0_i32_0, %c0_i32_1 : i32, i32, i32, i32
  }
}

</mosaic_0001>

<bundles_post_ra>
// kernel: tpu_custom_call.1
= control target key start
LH: loop header
LB: loop body
LE: loop exit
PB: predicated region body
PF: predicated region fallthrough
CT: control target
= control target key end

     0   :  { %s2437_s0 = inlined_call_operand.hbm [shape: f32[2,4,16,16], index: 0, kind: input, shape index: {}]   ;;  %s2438_s1 = inlined_call_operand.vmem [shape: f32[36], index: 1, kind: input, shape index: {}]   ;;  %s2439_s2 = inlined_call_operand.vmem [shape: f32[32], index: 2, kind: input, shape index: {}]   ;;  %s2440_s3 = inlined_call_operand.vmem [shape: f32[8], index: 3, kind: input, shape index: {}]   ;;  %s2441_s4 = inlined_call_operand.hbm [shape: f32[2,8,16,16], index: 4, kind: output, shape index: {}]  }
   0x1   :  { %2445 = sst [smem:[#allocation16_spill]] %s2437_s0 }
   0x2   :  { %9 = vsyncpa [#allocation4], 0 }
   0x3   :  { %11 = vsyncpa [#allocation4 + $0x1], 0 }
   0x4   :  { %12 = vsyncpa [#allocation6], 0 }
   0x5   :  { %13 = vsyncpa [#allocation9], 0 }
   0x6   :  { %14 = vsyncpa [#allocation5], 0 }
   0x7   :  { %16 = vsyncpa [#allocation5 + $0x1], 0  ;;  %s1658_s15 = smov 0   ;;  %s1660_s16 = smov 0  }
   0x8   :  { %s1662_s17 = smov 0   ;;  %s1664_s18 = smov 0  }
   0x9 LB: > { %s1679_s19 = sadd.s32 4294967295, %s1618_s18   ;;  %s1191_s20 = sadd.s32 4294967294, %s1618_s18   ;;  %s1618_s18 = sphi %s1664_s18, %s2465_s18   ;;  %s1614_s17 = sphi %s1662_s17, %s2464_s17   ;;  %s1610_s16 = sphi %s1660_s16, %s2463_s16   ;;  %s1606_s15 = sphi %s1658_s15, %s2462_s15  }
   0xa   : > { %p42_p0 = scmp.ne.s32.totalorder %s1610_s16, %s1606_s15  ;;  %p2442_p1 = scmp.eq.s32.totalorder %s1679_s19, 0 }
   0xb   : > { %p135_p3 = scmp.eq.s32.totalorder %s1191_s20, 1  ;;  %p1192_p5 = scmp.ge.s32.totalorder %s1618_s18, 1 }
   0xc   : > { %p1688_p4 = por %p2442_p1, %p42_p0  ;;  %p142_p7 = scmp.lt.s32.totalorder %s1618_s18, 3 }
   0xd   : > { %p1693_p6 = por %p135_p3, %p42_p0  ;;  %s166_s25 = sshll.u32 %s2439_s2, 4  ;;  %s167_s25 = int_to_ptr.vmem [resolvable:$true] %s166_s25 }
   0xe   : > { %s2446_s21 = scalar_select %p1688_p4, 1, 0 }
   0xf   : > { %s2447_s22 = scalar_select %p1693_p6, 1, 0 }
  0x10   : > { %p1701_p8 = pnand %p1192_p5, %p142_p7  ;;  %s155_s29 = sshll.u32 %s2438_s1, 4  ;;  %s156_s29 = int_to_ptr.vmem [resolvable:$true] %s155_s29 }
  0x11   : > { %s177_s7 = sshll.u32 %s2440_s3, 4  ;;  %s1469_s8 = scalar_lea.vmem %s167_s25, 16  ;;  %s1720_s7 = int_to_ptr.vmem [resolvable:$true] %s177_s7 }
  0x12   : > { %s2448_s26 = scalar_select %p1701_p8, 1, 0 }
  0x13   : > { %p1400_p10 = pneg %p1701_p8  ;;  %p1470_p12 = scmp.ne.s32.totalorder %s167_s25, %s1469_s8 }
  0x14   : > { %p1477_p5 = scmp.lt.s32.totalorder %s167_s25, %s167_s25  ;;  %p1478_p7 = scmp.lt.s32.totalorder %s1469_s8, %s1469_s8 }
  0x15   : > { %p1713_p11 = pnand %p1400_p10, %p2442_p1 }
  0x16   : > { %p1479_p10 = por %p1478_p7, %p1477_p5 }
  0x17   : > { %p1471_p13 = pneg %p1713_p11 }
  0x19   : > { %p1472_p0 = pnand %p1471_p13, %p1470_p12 }
  0x1b   : > { %p1473_p3 = pneg %p1472_p0 }
  0x1d   : > { %p1480_p9 = pnand %p1479_p10, %p1473_p3 }
  0x1f   : > { %1483 = shalt.err (!%p1480_p9)
}
  0x20   : > { %s1620_s9 = smov [#allocation8]   ;;  %s1484_s10 = scalar_lea.vmem %s156_s29, 16 }
  0x21   : > { %1406 = dma.vmem_to_smem (!%p1713_p11), %s167_s25, 16, %s1620_s9, [#allocation9]  }
  0x22   : > { %p1485_p1 = scmp.ne.s32.totalorder %s156_s29, %s1484_s10  ;;  %p1492_p4 = scmp.lt.s32.totalorder %s156_s29, %s156_s29 }
  0x23   : > { %p1493_p8 = scmp.lt.s32.totalorder %s1484_s10, %s1484_s10 }
  0x24   : > { %p1487_p2 = pnand %p1485_p1, %p1471_p13 }
  0x25   : > { %p1494_p12 = por %p1493_p8, %p1492_p4 }
  0x26   : > { %p1488_p6 = pneg %p1487_p2 }
  0x28   : > { %p1495_p0 = pnand %p1494_p12, %p1488_p6 }
  0x2a   : > { %1498 = shalt.err (!%p1495_p0)
}
  0x2b   : > { %s1621_s11 = smov [#allocation7]   ;;  %s1499_s12 = scalar_lea.vmem %s1720_s7, 16 }
  0x2c   : > { %1403 = dma.vmem_to_smem (!%p1713_p11), %s156_s29, 16, %s1621_s11, [#allocation6]  }
  0x2d   : > { %p1500_p9 = scmp.ne.s32.totalorder %s1720_s7, %s1499_s12  ;;  %p1507_p2 = scmp.lt.s32.totalorder %s1720_s7, %s1720_s7 }
  0x2e   : > { %p1508_p5 = scmp.lt.s32.totalorder %s1499_s12, %s1499_s12 }
  0x2f   : > { %p1502_p3 = pnand %p1500_p9, %p1471_p13 }
  0x30   : > { %p1509_p4 = por %p1508_p5, %p1507_p2 }
  0x31   : > { %p1503_p1 = pneg %p1502_p3 }
  0x33   : > { %p1510_p6 = pnand %p1509_p4, %p1503_p1 }
  0x35   : > { %1513 = shalt.err (!%p1510_p6)
}
  0x36   : > { %s1622_s13 = smov [#allocation10]   ;;  %s1745_s14 = sadd.s32 1, %s1618_s18  }
  0x37   : > { %1409 = dma.vmem_to_smem (!%p1713_p11), %s1720_s7, 16, %s1622_s13, [#allocation9]  }
  0x38   : > { %s26_s20 = ssub.s32 %s1618_s18, %s1745_s14  ;;  %s29_s23 = sadd.s32 1, %s1614_s17 }
  0x39   : > { %p27_p8 = scmp.eq.s32.totalorder %s26_s20, 0  ;;  %p36_p13 = scmp.ne.s32.totalorder %s1614_s17, %s1610_s16 }
  0x3a   : > { %p37_p7 = scmp.eq.s32.totalorder %s1618_s18, 0  ;;  %p1421_p10 = scmp.lt.s32.totalorder %s1618_s18, 2 }
  0x3b   : > { %s1755_s24 = scalar_select %p27_p8, %s1614_s17, %s29_s23  }
  0x3c   : > { %p38_p12 = por %p37_p7, %p36_p13  ;;  %p2450_p0 = scmp.eq.s32.totalorder %s1679_s19, 1 }
  0x3d   : > { %s188_s27 = sand.u32 1, %s1614_s17   ;;  %s1382_s28 = sshll.u32 %s1618_s18, 10 }
  0x3e   : > { %p1759_p9 = por %p2450_p0, %p36_p13  ;;  %s1197_s29 = sshll.u32 %s188_s27, 6 }
  0x3f   : > { %s2452_s0 = sld [smem:[#allocation16_spill]]  ;;  %s192_s7 = scalar_lea.vmem [#allocation3], %s1197_s29 }
  0x40   : > { %s199_s8 = sshll.u32 %s192_s7, 4  ;;  %p1770_p11 = pnand %p1421_p10, %p38_p12  ;;  %s1774_s8 = int_to_ptr.vmem [resolvable:$true] %s199_s8 }
  0x41   : > { %s1776_s10 = scalar_lea.sflag [#allocation4], %s188_s27 }
  0x42   : > { %p1516_p1 = pneg %p1770_p11 }
  0x45   : > { %s1768_s6 = scalar_lea.hbm %s2452_s0, %s1382_s28  ;;  %s1519_s20 = scalar_lea.hbm %s2452_s0, 2048 }
  0x46   : > { %s1514_s11 = scalar_lea.hbm %s1768_s6, 1024  ;;  %p1520_p4 = scmp.lt.u32.totalorder %s1768_s6, %s2452_s0 }
  0x47   : > { %p1515_p3 = scmp.ne.s32.totalorder %s1768_s6, %s1514_s11  ;;  %p1521_p6 = scmp.lt.u32.totalorder %s1519_s20, %s1514_s11 }
  0x48   : > { %p1523_p13 = scmp.lt.u32.totalorder %s1514_s11, %s1768_s6 }
  0x49   : > { %p1517_p2 = pnand %p1516_p1, %p1515_p3  ;;  %p1522_p8 = por %p1521_p6, %p1520_p4 }
  0x4b   : > { %p1518_p5 = pneg %p1517_p2  ;;  %p1524_p7 = por %p1523_p13, %p1522_p8 }
  0x4d   : > { %p1525_p10 = pnand %p1524_p7, %p1518_p5 }
  0x4f   : > { %1528 = shalt.err (!%p1525_p10)
}
  0x50   : > { %s1529_s27 = scalar_lea.vmem %s1774_s8, 1024  ;;  %s1623_s29 = smov [#allocation3]  }
  0x51   : > { %p1530_p12 = scmp.ne.s32.totalorder %s1774_s8, %s1529_s27  ;;  %s1534_s30 = sshll.u32 %s1623_s29, 4  ;;  %s1535_s30 = int_to_ptr.vmem [resolvable:$false] %s1534_s30 }
  0x52   : > { %s1536_s5 = scalar_lea.vmem %s1535_s30, 2048  ;;  %p1537_p2 = scmp.lt.s32.totalorder %s1774_s8, %s1535_s30 }
  0x53   : > { %p1532_p0 = pnand %p1530_p12, %p1516_p1  ;;  %p1538_p4 = scmp.lt.s32.totalorder %s1536_s5, %s1529_s27 }
  0x55   : > { %p1533_p3 = pneg %p1532_p0  ;;  %p1539_p6 = por %p1538_p4, %p1537_p2 }
  0x57   : > { %p1540_p8 = pnand %p1539_p6, %p1533_p3 }
  0x59   : > { %1543 = shalt.err (!%p1540_p8)
}
  0x5a   : > { %s1624_s7 = smov 128   ;;  %s1625_s11 = smov 8  }
  0x5b   : > { %1413 = dma.hbm_to_vmem [thread:$0]  (!%p1770_p11), %s1768_s6, 1024, %s1774_s8, %s1776_s10, %s1624_s7, %s1624_s7, %s1625_s11  }
  0x5c   : > { %p2454_p1 = scmp.ne.s32.totalorder %s2448_s26, 0 }
  0x5d   : > { %s1807_s12 = sand.u32 (!%p2454_p1), 1, %s1610_s16   ;;  %p2455_p5 = scmp.ne.s32.totalorder (!%p2454_p1), %s2446_s21, 0 }
  0x5e   : > { %211 = sbr.rel (%p2454_p1) target bundleno = 476 (0x1dc), region = 36  ;;  %s1201_s13 = sshll.u32 (!%p2454_p1), %s1807_s12, 6 }
  0x5f   : > { %s214_s20 = scalar_lea.sflag (!%p2454_p1), [#allocation4], %s1807_s12  ;;  %s1811_s23 = scalar_lea.vmem (!%p2454_p1), [#allocation3], %s1201_s13 }
  0x65   : > { %1589 = dma.done.wait (%p2455_p5), %s214_s20, 1024  }
  0x66   : > { %1591 = vsyncadd (%p2455_p5), %s214_s20, 4294966272  ;;  %p2456_p11 = scmp.eq.s32.totalorder %s1679_s19, 0 }
  0x68   : > { %1593 = dma.done.wait (%p2456_p11), [#allocation6], 16   ;;  %p2457_p13 = pmov %p2456_p11 }
  0x69   : > { %p2458_p7 = pmov %p2456_p11 }
  0x6a   : > { %1595 = vsyncadd (%p2457_p13), [#allocation6], 4294967280 }
  0x6b   : > { %1597 = dma.done.wait (%p2458_p7), [#allocation9], 32   ;;  %p2459_p10 = pmov %p2458_p7 }
  0x6d   : > { %1599 = vsyncadd (%p2459_p10), [#allocation9], 4294967264 }
  0x6e   : > { %234 = sfence }
  0x6f   : > { %v269_v0 = vld [vmem:[%s1811_s23] sm:$0xff]  ;;  %v271_v1 = vld [vmem:[%s1811_s23 + $0x10] sm:$0xff]  ;;  %vm255_vm0 = vcmask 146432   ;;  %s1626_s21 = smov 1   ;;  %vm258_vm1 = vcmask 140288   ;;  %v270_v2 = vld [vmem:[%s1811_s23 + $0x8] sm:$0xff] }
  0x70   : > { %285 = vrot.lane.b32.xlu0 %v269_v0, %s1626_s21  ;;  %289 = vrot.lane.b32.xlu1 %v271_v1, %s1626_s21  ;;  %v272_v3 = vld [vmem:[%s1811_s23 + $0x18] sm:$0xff]  ;;  %v1627_v4 = vmov 0.0   ;;  %v273_v5 = vld [vmem:[%s1811_s23 + $0x20] sm:$0xff]  ;;  %vm309_vm2 = vcmask 138248   ;;  %s1206_s26 = sld [smem:[#allocation7 + $0x1]]  ;;  %s1835_s6 = sld [smem:[#allocation7 + $0x2]] }
  0x71   : > { %256 = vst.msk [vmem:[#allocation2] sm:$0xff] %vm255_vm0, %v1627_v4  ;;  %257 = vst.msk [vmem:[#allocation2 + $0x8] sm:$0xff] %vm255_vm0, %v1627_v4  ;;  %v274_v6 = vld [vmem:[%s1811_s23 + $0x28] sm:$0xff]  ;;  %v275_v7 = vld [vmem:[%s1811_s23 + $0x30] sm:$0xff]  ;;  %s1839_s8 = sld [smem:[#allocation7 + $0x4]]  ;;  %s1847_s9 = sld [smem:[#allocation7 + $0x5]] }
  0x72   : > { %260 = vst.msk [vmem:[#allocation2 + $0x18] sm:$0xff] %vm255_vm0, %v1627_v4  ;;  %261 = vst.msk [vmem:[#allocation2 + $0x20] sm:$0xff] %vm255_vm0, %v1627_v4  ;;  %v276_v8 = vld [vmem:[%s1811_s23 + $0x38] sm:$0xff]  ;;  %s1628_s10 = smov 127   ;;  %s1852_s28 = sld [smem:[#allocation7 + $0xa]]  ;;  %vm432_vm3 = vcmask 130048  }
  0x73   : > { %263 = vst.msk [vmem:[#allocation2 + $0x30] sm:$0xff] %vm255_vm0, %v1627_v4  ;;  %264 = vst.msk [vmem:[#allocation2 + $0x38] sm:$0xff] %vm255_vm0, %v1627_v4  ;;  %s1629_s27 = smov 126   ;;  %s1212_s29 = sld [smem:[#allocation7 + $0x7]] }
  0x74   : > { %266 = vst.msk [vmem:[#allocation2 + $0x48] sm:$0xff] %vm255_vm0, %v1627_v4  ;;  %267 = vst.msk [vmem:[#allocation2 + $0x50] sm:$0xff] %vm255_vm0, %v1627_v4  ;;  %287 = vrot.lane.b32.xlu0 %v270_v2, %s1626_s21  ;;  %291 = vrot.lane.b32.xlu1 %v272_v3, %s1626_s21  ;;  %s1244_s30 = sld [smem:[#allocation7 + $0xb]]  ;;  %s1213_s5 = sld [smem:[#allocation7 + $0x8]] }
  0x75   : > { %259 = vst.msk [vmem:[#allocation2 + $0x10] sm:$0x3] %vm258_vm1, %v1627_v4  ;;  %262 = vst.msk [vmem:[#allocation2 + $0x28] sm:$0x3] %vm258_vm1, %v1627_v4  ;;  %s1246_s7 = sld [smem:[#allocation7 + $0xd]]  ;;  %s1247_s11 = sld [smem:[#allocation7 + $0xe]] }
  0x76   : > { %265 = vst.msk [vmem:[#allocation2 + $0x40] sm:$0x3] %vm258_vm1, %v1627_v4  ;;  %268 = vst.msk [vmem:[#allocation2 + $0x58] sm:$0x3] %vm258_vm1, %v1627_v4  ;;  %v325_v13 = vstv %s1206_s26  ;;  %v339_v18 = vstv %s1835_s6  ;;  %s1288_s13 = sld [smem:[#allocation7 + $0x13]]  ;;  %s1249_s20 = sld [smem:[#allocation7 + $0x10]] }
  0x77   : > { %v361_v25 = vstv %s1839_s8  ;;  %v375_v29 = vstv %s1847_s9  ;;  %s1289_s23 = sld [smem:[#allocation7 + $0x14]]  ;;  %s1291_s26 = sld [smem:[#allocation7 + $0x16]] }
  0x78   : > { %293 = vrot.lane.b32.xlu0 %v273_v5, %s1626_s21  ;;  %295 = vrot.lane.b32.xlu1 %v274_v6, %s1626_s21  ;;  %v520_v31 = vstv %s1852_s28  ;;  %s1292_s6 = sld [smem:[#allocation7 + $0x17]]  ;;  %s1333_s8 = sld [smem:[#allocation7 + $0x1c]] }
  0x79   : > { %v397_v38 = vstv %s1212_s29  ;;  %s1294_s9 = sld [smem:[#allocation7 + $0x19]]  ;;  %s1334_s28 = sld [smem:[#allocation7 + $0x1d]] }
  0x7a   : > { %v534_v42 = vstv %s1244_s30  ;;  %v411_v45 = vstv %s1213_s5  ;;  %s1295_s29 = sld [smem:[#allocation7 + $0x1a]]  ;;  %s1336_s30 = sld [smem:[#allocation7 + $0x1f]] }
  0x7b   : > { %v556_v49 = vstv %s1246_s7  ;;  %v570_v53 = vstv %s1247_s11  ;;  %s1337_s5 = sld [smem:[#allocation7 + $0x20]]  ;;  %s1339_s7 = sld [smem:[#allocation7 + $0x22]] }
  0x7c   : > { %297 = vrot.lane.b32.xlu0 %v275_v7, %s1626_s21  ;;  %299 = vrot.lane.b32.xlu1 %v276_v8, %s1626_s21  ;;  %v707_v55 = vstv %s1288_s13  ;;  %v592_v62 = vstv %s1249_s20  ;;  %s1250_s21 = sld [smem:[#allocation7 + $0x11]]  ;;  %s1340_s11 = sld [smem:[#allocation7 + $0x23]] }
  0x7d   : > { %v721_v2 = vstv %s1289_s23  ;;  %s320_s13 = sld [smem:[#allocation7]]  ;;  %s1208_s20 = sld [smem:[#allocation7 + $0x3]] }
  0x7e   : > { %s1998_s23 = sld [smem:[#allocation7 + $0x6]]  ;;  %s2043_s0 = sld [smem:[#allocation10 + $0x7]] }
  0x82   : > { %v606_v5 = vstv %s1250_s21  ;;  %s2009_s21 = sld [smem:[#allocation8]] }
  0xe2   : > { %v286_v9 = vpop.permute.xlu0 %285  ;;  %v290_v10 = vpop.permute.xlu1 %289 }
  0xe3   : > { %310 = vst.msk [vmem:[#allocation2 + $0x1] sm:$0xff] %vm309_vm2, %v286_v9  ;;  %312 = vst.msk [vmem:[#allocation2 + $0x19] sm:$0xff] %vm309_vm2, %v290_v10  ;;  %v743_v9 = vstv %s1291_s26  ;;  %s2011_s26 = sld [smem:[#allocation10]] }
  0xe6   : > { %v288_v11 = vpop.permute.xlu0 %287  ;;  %v292_v12 = vpop.permute.xlu1 %291 }
  0xe7   : > { %311 = vst.msk [vmem:[#allocation2 + $0x9] sm:$0xff] %vm309_vm2, %v288_v11  ;;  %313 = vst.msk [vmem:[#allocation2 + $0x21] sm:$0xff] %vm309_vm2, %v292_v12 }
  0xea   : > { %v1841_v14 = vld [vmem:[#allocation2] sm:$0xff]  ;;  %v294_v15 = vpop.permute.xlu0 %293  ;;  %v296_v16 = vpop.permute.xlu1 %295  ;;  %v1870_v30 = vld [vmem:[#allocation2 + $0x18] sm:$0xff] }
  0xeb   : > { %v326_v17 = vmul.f32 %v325_v13, %v1841_v14  ;;  %314 = vst.msk [vmem:[#allocation2 + $0x31] sm:$0xff] %vm309_vm2, %v294_v15  ;;  %315 = vst.msk [vmem:[#allocation2 + $0x39] sm:$0xff] %vm309_vm2, %v296_v16  ;;  %v340_v23 = vmul.f32 %v339_v18, %v1841_v14  ;;  %v1858_v24 = vld [vmem:[#allocation2 + $0x1] sm:$0xff]  ;;  %v521_v34 = vmul.f32 %v520_v31, %v1870_v30  ;;  %v1897_v48 = vld [vmem:[#allocation2 + $0x19] sm:$0xff]  ;;  %v894_v16 = vstv %s1333_s8  ;;  %s2015_s8 = sld [smem:[#allocation10 + $0x1]] }
  0xec   : > { %v362_v27 = vmul.f32 %v361_v25, %v1858_v24  ;;  %v376_v33 = vmul.f32 %v375_v29, %v1858_v24  ;;  %v535_v44 = vmul.f32 %v534_v42, %v1870_v30  ;;  %v557_v51 = vmul.f32 %v556_v49, %v1897_v48 }
  0xed   : > { %330 = vrot.lane.b32.xlu0 %v326_v17, %s1628_s10  ;;  %v571_v57 = vmul.f32 %v570_v53, %v1897_v48 }
  0xee   : > { %v1850_v19 = vld [vmem:[#allocation2 + $0x8] sm:$0xff]  ;;  %v298_v20 = vpop.permute.xlu0 %297  ;;  %v300_v21 = vpop.permute.xlu1 %299  ;;  %v1879_v36 = vld [vmem:[#allocation2 + $0x20] sm:$0xff] }
  0xef   : > { %v327_v22 = vmul.f32 %v325_v13, %v1850_v19  ;;  %316 = vst.msk [vmem:[#allocation2 + $0x49] sm:$0xff] %vm309_vm2, %v298_v20  ;;  %317 = vst.msk [vmem:[#allocation2 + $0x51] sm:$0xff] %vm309_vm2, %v300_v21  ;;  %v341_v26 = vmul.f32 %v339_v18, %v1850_v19  ;;  %v1865_v28 = vld [vmem:[#allocation2 + $0x9] sm:$0xff]  ;;  %v522_v39 = vmul.f32 %v520_v31, %v1879_v36  ;;  %v1903_v52 = vld [vmem:[#allocation2 + $0x21] sm:$0xff]  ;;  %v757_v13 = vstv %s1292_s6  ;;  %s2013_s6 = sld [smem:[#allocation8 + $0x4]] }
  0xf0   : > { %v363_v32 = vmul.f32 %v361_v25, %v1865_v28  ;;  %v377_v35 = vmul.f32 %v375_v29, %v1865_v28  ;;  %v1881_v37 = vld [vmem:[#allocation2 + $0x2] sm:$0xff]  ;;  %v1887_v41 = vld [vmem:[#allocation2 + $0xa] sm:$0xff]  ;;  %v536_v46 = vmul.f32 %v534_v42, %v1879_v36  ;;  %v558_v56 = vmul.f32 %v556_v49, %v1903_v52  ;;  %v1917_v61 = vld [vmem:[#allocation2 + $0x1a] sm:$0xff] }
  0xf1   : > { %332 = vrot.lane.b32.xlu1 %v327_v22, %s1628_s10  ;;  %344 = vrot.lane.b32.xlu0 %v340_v23, %s1629_s27  ;;  %v398_v40 = vmul.f32 %v397_v38, %v1881_v37  ;;  %v399_v43 = vmul.f32 %v397_v38, %v1887_v41  ;;  %v412_v47 = vmul.f32 %v411_v45, %v1881_v37  ;;  %v1923_v1 = vld [vmem:[#allocation2 + $0x22] sm:$0xff]  ;;  %v779_v25 = vstv %s1294_s9  ;;  %s2018_s9 = sld [smem:[#allocation8 + $0x8]] }
  0xf2   : > { %v413_v50 = vmul.f32 %v411_v45, %v1887_v41  ;;  %v1907_v54 = vld [vmem:[#allocation2 + $0x30] sm:$0xff]  ;;  %v1914_v59 = vld [vmem:[#allocation2 + $0x38] sm:$0xff]  ;;  %v572_v60 = vmul.f32 %v570_v53, %v1903_v52  ;;  %v593_v0 = vmul.f32 %v592_v62, %v1917_v61  ;;  %v594_v3 = vmul.f32 %v592_v62, %v1923_v1 }
  0xf3   : > { %v708_v58 = vmul.f32 %v707_v55, %v1907_v54  ;;  %v709_v63 = vmul.f32 %v707_v55, %v1914_v59  ;;  %v722_v4 = vmul.f32 %v721_v2, %v1907_v54  ;;  %v723_v6 = vmul.f32 %v721_v2, %v1914_v59  ;;  %v1933_v8 = vld [vmem:[#allocation2 + $0x31] sm:$0xff]  ;;  %v1939_v12 = vld [vmem:[#allocation2 + $0x39] sm:$0xff] }
  0xf4   : > { %v607_v7 = vmul.f32 %v606_v5, %v1917_v61  ;;  %v608_v10 = vmul.f32 %v606_v5, %v1923_v1  ;;  %v744_v11 = vmul.f32 %v743_v9, %v1933_v8  ;;  %v745_v17 = vmul.f32 %v743_v9, %v1939_v12  ;;  %v1953_v23 = vld [vmem:[#allocation2 + $0x32] sm:$0xff]  ;;  %v1959_v29 = vld [vmem:[#allocation2 + $0x3a] sm:$0xff] }
  0xf5   : > { %346 = vrot.lane.b32.xlu1 %v341_v26, %s1629_s27  ;;  %366 = vrot.lane.b32.xlu0 %v362_v27, %s1628_s10  ;;  %v758_v18 = vmul.f32 %v757_v13, %v1933_v8  ;;  %v759_v22 = vmul.f32 %v757_v13, %v1939_v12  ;;  %v780_v27 = vmul.f32 %v779_v25, %v1953_v23  ;;  %v908_v31 = vstv %s1334_s28  ;;  %s2020_s28 = sld [smem:[#allocation10 + $0x2]] }
  0xf6   : > { %v1943_v15 = vld [vmem:[#allocation2 + $0x48] sm:$0xff]  ;;  %v1950_v21 = vld [vmem:[#allocation2 + $0x50] sm:$0xff]  ;;  %v944_v45 = vstv %s1337_s5  ;;  %v321_v62 = vstv %s320_s13  ;;  %v355_v2 = vstv %s1208_s20  ;;  %s2027_s5 = sld [smem:[#allocation8 + $0x10]]  ;;  %s2033_s13 = sld [smem:[#allocation10 + $0x5]] }
  0xf7   : > { %v895_v20 = vmul.f32 %v894_v16, %v1943_v15  ;;  %v896_v26 = vmul.f32 %v894_v16, %v1950_v21  ;;  %v1981_v49 = vld [vmem:[#allocation2 + $0x4a] sm:$0xff]  ;;  %v1987_v55 = vld [vmem:[#allocation2 + $0x52] sm:$0xff]  ;;  %v356_v9 = vmul.f32 %v355_v2, %v1858_v24  ;;  %s2036_s20 = sld [smem:[#allocation8 + $0x18]] }
  0xf9   : > { %368 = vrot.lane.b32.xlu1 %v363_v32, %s1628_s10  ;;  %380 = vrot.lane.b32.xlu0 %v376_v33, %s1629_s27  ;;  %v781_v32 = vmul.f32 %v779_v25, %v1959_v29  ;;  %v909_v33 = vmul.f32 %v908_v31, %v1943_v15 }
  0xfd   : > { %382 = vrot.lane.b32.xlu1 %v377_v35, %s1629_s27  ;;  %525 = vrot.lane.b32.xlu0 %v521_v34, %s1628_s10  ;;  %v793_v34 = vstv %s1295_s29  ;;  %v910_v35 = vmul.f32 %v908_v31, %v1950_v21  ;;  %s2023_s29 = sld [smem:[#allocation8 + $0xc]] }
  0xfe   : > { %v794_v38 = vmul.f32 %v793_v34, %v1953_v23  ;;  %v795_v42 = vmul.f32 %v793_v34, %v1959_v29 }
 0x101   : > { %527 = vrot.lane.b32.xlu1 %v522_v39, %s1628_s10  ;;  %402 = vrot.lane.b32.xlu0 %v398_v40, %s1628_s10  ;;  %v1969_v39 = vld [vmem:[#allocation2 + $0x49] sm:$0xff]  ;;  %v930_v40 = vstv %s1336_s30  ;;  %s2025_s30 = sld [smem:[#allocation10 + $0x3]] }
 0x105   : > { %404 = vrot.lane.b32.xlu1 %v399_v43, %s1628_s10  ;;  %539 = vrot.lane.b32.xlu0 %v535_v44, %s1629_s27  ;;  %v931_v43 = vmul.f32 %v930_v40, %v1969_v39  ;;  %v1975_v44 = vld [vmem:[#allocation2 + $0x51] sm:$0xff] }
 0x109   : > { %541 = vrot.lane.b32.xlu1 %v536_v46, %s1629_s27  ;;  %416 = vrot.lane.b32.xlu0 %v412_v47, %s1629_s27  ;;  %v932_v46 = vmul.f32 %v930_v40, %v1975_v44  ;;  %v945_v47 = vmul.f32 %v944_v45, %v1969_v39 }
 0x10d   : > { %418 = vrot.lane.b32.xlu1 %v413_v50, %s1629_s27  ;;  %561 = vrot.lane.b32.xlu0 %v557_v51, %s1628_s10  ;;  %v966_v50 = vstv %s1339_s7  ;;  %v946_v51 = vmul.f32 %v944_v45, %v1975_v44  ;;  %s2029_s7 = sld [smem:[#allocation10 + $0x4]] }
 0x10e   : > { %v967_v53 = vmul.f32 %v966_v50, %v1981_v49 }
 0x111   : > { %563 = vrot.lane.b32.xlu1 %v558_v56, %s1628_s10  ;;  %575 = vrot.lane.b32.xlu0 %v571_v57, %s1629_s27  ;;  %v980_v56 = vstv %s1340_s11  ;;  %v968_v57 = vmul.f32 %v966_v50, %v1987_v55  ;;  %s2031_s11 = sld [smem:[#allocation8 + $0x14]] }
 0x115   : > { %577 = vrot.lane.b32.xlu1 %v572_v60, %s1629_s27  ;;  %712 = vrot.lane.b32.xlu0 %v708_v58, %s1628_s10  ;;  %v981_v58 = vmul.f32 %v980_v56, %v1981_v49  ;;  %v982_v60 = vmul.f32 %v980_v56, %v1987_v55  ;;  %v429_v56 = vstv %s2011_s26  ;;  %s2124_s26 = sld [smem:[#allocation8 + $0x1]] }
 0x119   : > { %714 = vrot.lane.b32.xlu1 %v709_v63, %s1628_s10  ;;  %597 = vrot.lane.b32.xlu0 %v593_v0, %s1628_s10  ;;  %v322_v0 = vmul.f32 %v321_v62, %v1841_v14  ;;  %v391_v14 = vstv %s1998_s23  ;;  %s2038_s23 = sld [smem:[#allocation8 + $0x1c]] }
 0x11a   : > { %v393_v34 = vmul.f32 %v391_v14, %v1887_v41 }
 0x11d   : > { %599 = vrot.lane.b32.xlu1 %v594_v3, %s1628_s10  ;;  %726 = vrot.lane.b32.xlu0 %v722_v4, %s1629_s27 }
 0x121   : > { %728 = vrot.lane.b32.xlu1 %v723_v6, %s1629_s27  ;;  %611 = vrot.lane.b32.xlu0 %v607_v7, %s1629_s27  ;;  %v323_v6 = vmul.f32 %v321_v62, %v1850_v19  ;;  %v392_v19 = vmul.f32 %v391_v14, %v1881_v37 }
 0x125   : > { %613 = vrot.lane.b32.xlu1 %v608_v10, %s1629_s27  ;;  %748 = vrot.lane.b32.xlu0 %v744_v11, %s1628_s10 }
 0x129   : > { %750 = vrot.lane.b32.xlu1 %v745_v17, %s1628_s10  ;;  %762 = vrot.lane.b32.xlu0 %v758_v18, %s1629_s27  ;;  %v357_v18 = vmul.f32 %v355_v2, %v1865_v28 }
 0x12d   : > { %764 = vrot.lane.b32.xlu1 %v759_v22, %s1629_s27  ;;  %899 = vrot.lane.b32.xlu0 %v895_v20, %s1628_s10 }
 0x131   : > { %901 = vrot.lane.b32.xlu1 %v896_v26, %s1628_s10  ;;  %784 = vrot.lane.b32.xlu0 %v780_v27, %s1628_s10 }
 0x135   : > { %786 = vrot.lane.b32.xlu1 %v781_v32, %s1628_s10  ;;  %913 = vrot.lane.b32.xlu0 %v909_v33, %s1629_s27 }
 0x139   : > { %915 = vrot.lane.b32.xlu1 %v910_v35, %s1629_s27  ;;  %798 = vrot.lane.b32.xlu0 %v794_v38, %s1629_s27 }
 0x13d   : > { %800 = vrot.lane.b32.xlu1 %v795_v42, %s1629_s27  ;;  %935 = vrot.lane.b32.xlu0 %v931_v43, %s1628_s10 }
 0x141   : > { %937 = vrot.lane.b32.xlu1 %v932_v46, %s1628_s10  ;;  %949 = vrot.lane.b32.xlu0 %v945_v47, %s1629_s27 }
 0x145   : > { %951 = vrot.lane.b32.xlu1 %v946_v51, %s1629_s27  ;;  %971 = vrot.lane.b32.xlu0 %v967_v53, %s1628_s10  ;;  %v425_v53 = vstv %s2009_s21  ;;  %s1205_s21 = sshll.u32 %s1807_s12, 7 }
 0x149   : > { %973 = vrot.lane.b32.xlu1 %v968_v57, %s1628_s10  ;;  %985 = vrot.lane.b32.xlu0 %v981_v58, %s1629_s27  ;;  %s2003_s10 = sld [smem:[#allocation7 + $0x9]]  ;;  %v436_v57 = vstv %s2013_s6  ;;  %v440_v58 = vstv %s2015_s8  ;;  %s2077_s6 = scalar_lea.vmem [#allocation11], %s1205_s21 }
 0x14a   : > { %s2126_s8 = sld [smem:[#allocation8 + $0x5]]  ;;  %s2216_s21 = sld [smem:[#allocation8 + $0xa]] }
 0x14d   : > { %987 = vrot.lane.b32.xlu1 %v982_v60, %s1629_s27  ;;  %s2007_s27 = sld [smem:[#allocation7 + $0xc]]  ;;  %v447_v60 = vstv %s2018_s9  ;;  %s2096_s9 = sld [smem:[#allocation7 + $0x15]] }
 0x14f   : > { %v516_v37 = vstv %s2003_s10  ;;  %s2041_s10 = sld [smem:[#allocation10 + $0x6]] }
 0x150   : > { %v517_v41 = vmul.f32 %v516_v37, %v1870_v30  ;;  %v518_v45 = vmul.f32 %v516_v37, %v1879_v36  ;;  %v451_v36 = vstv %s2020_s28  ;;  %s2129_s28 = sld [smem:[#allocation8 + $0x9]] }
 0x153   : > { %v550_v42 = vstv %s2007_s27  ;;  %s2059_s27 = sld [smem:[#allocation7 + $0xf]] }
 0x154   : > { %v551_v47 = vmul.f32 %v550_v42, %v1897_v48  ;;  %v552_v50 = vmul.f32 %v550_v42, %v1903_v52  ;;  %v462_v48 = vstv %s2025_s30  ;;  %s2133_s30 = sld [smem:[#allocation8 + $0x11]] }
 0x15f   : > { %v331_v63 = vpop.permute.xlu0 %330 }
 0x160   : > { %v336_v3 = vadd.f32 %v331_v63, %v322_v0  ;;  %v458_v63 = vstv %s2023_s29  ;;  %s2131_s29 = sld [smem:[#allocation8 + $0xd]] }
 0x163   : > { %v333_v4 = vpop.permute.xlu1 %332  ;;  %v345_v5 = vpop.permute.xlu0 %344 }
 0x164   : > { %v350_v7 = vadd.f32 %v345_v5, %v336_v3  ;;  %v337_v10 = vadd.f32 %v333_v4, %v323_v6  ;;  %v469_v3 = vstv %s2027_s5  ;;  %v473_v4 = vstv %s2029_s7  ;;  %s2135_s5 = sld [smem:[#allocation8 + $0x15]]  ;;  %s2138_s7 = sld [smem:[#allocation8 + $0x19]] }
 0x165   : > { %v480_v5 = vstv %s2031_s11  ;;  %s2140_s11 = sld [smem:[#allocation8 + $0x1d]] }
 0x166   : > { %v358_v11 = vadd.f32 %v356_v9, %v350_v7  ;;  %v484_v7 = vstv %s2033_s13  ;;  %v491_v9 = vstv %s2036_s20  ;;  %s2150_s13 = sld [smem:[#allocation7 + $0x18]]  ;;  %s2164_s20 = sld [smem:[#allocation7 + $0x1b]] }
 0x167   : > { %v347_v13 = vpop.permute.xlu1 %346  ;;  %v367_v16 = vpop.permute.xlu0 %366 }
 0x168   : > { %v351_v17 = vadd.f32 %v347_v13, %v337_v10  ;;  %v372_v20 = vadd.f32 %v367_v16, %v358_v11  ;;  %v502_v10 = vstv %s2038_s23  ;;  %s2188_s23 = sld [smem:[#allocation7 + $0x1e]] }
 0x16a   : > { %v359_v22 = vadd.f32 %v357_v18, %v351_v17  ;;  %v495_v17 = vstv %s2041_s10  ;;  %v506_v18 = vstv %s2043_s0  ;;  %s2075_s0 = sld [smem:[#allocation7 + $0x12]] }
 0x16b   : > { %v369_v25 = vpop.permute.xlu1 %368  ;;  %v381_v26 = vpop.permute.xlu0 %380  ;;  %s2211_s10 = sld [smem:[#allocation8 + $0x2]] }
 0x16c   : > { %v386_v27 = vadd.f32 %v381_v26, %v372_v20  ;;  %v373_v24 = vadd.f32 %v369_v25, %v359_v22 }
 0x16e   : > { %v394_v31 = vadd.f32 %v392_v19, %v386_v27 }
 0x16f   : > { %v383_v28 = vpop.permute.xlu1 %382  ;;  %v526_v32 = vpop.permute.xlu0 %525 }
 0x170   : > { %v387_v33 = vadd.f32 %v383_v28, %v373_v24  ;;  %v531_v43 = vadd.f32 %v526_v32, %v517_v41 }
 0x172   : > { %v395_v35 = vadd.f32 %v393_v34, %v387_v33 }
 0x173   : > { %v528_v38 = vpop.permute.xlu1 %527  ;;  %v403_v40 = vpop.permute.xlu0 %402 }
 0x174   : > { %v408_v62 = vadd.f32 %v403_v40, %v394_v31  ;;  %v532_v52 = vadd.f32 %v528_v38, %v518_v45 }
 0x177   : > { %v405_v46 = vpop.permute.xlu1 %404  ;;  %v540_v30 = vpop.permute.xlu0 %539 }
 0x178   : > { %v545_v51 = vadd.f32 %v540_v30, %v531_v43  ;;  %v409_v13 = vadd.f32 %v405_v46, %v395_v35 }
 0x17a   : > { %v553_v0 = vadd.f32 %v551_v47, %v545_v51  ;;  %v586_v47 = vstv %s2059_s27  ;;  %s2213_s27 = sld [smem:[#allocation8 + $0x6]] }
 0x17b   : > { %v542_v2 = vpop.permute.xlu1 %541  ;;  %v417_v6 = vpop.permute.xlu0 %416 }
 0x17c   : > { %v422_v11 = vadd.f32 %v417_v6, %v408_v62  ;;  %v546_v16 = vadd.f32 %v542_v2, %v532_v52 }
 0x17e   : > { %v426_v14 = vmul.f32 %v425_v53, %v422_v11  ;;  %v437_v20 = vmul.f32 %v436_v57, %v422_v11  ;;  %v448_v22 = vmul.f32 %v447_v60, %v422_v11  ;;  %v459_v25 = vmul.f32 %v458_v63, %v422_v11 }
 0x17f   : > { %v470_v26 = vmul.f32 %v469_v3, %v422_v11  ;;  %v481_v27 = vmul.f32 %v480_v5, %v422_v11  ;;  %v492_v19 = vmul.f32 %v491_v9, %v422_v11  ;;  %v503_v24 = vmul.f32 %v502_v10, %v422_v11  ;;  %v419_v31 = vpop.permute.xlu1 %418  ;;  %v562_v28 = vpop.permute.xlu0 %561 }
 0x180   : > { %v430_v32 = vadd.f32 %v429_v56, %v426_v14  ;;  %v441_v33 = vadd.f32 %v440_v58, %v437_v20  ;;  %v452_v34 = vadd.f32 %v451_v36, %v448_v22  ;;  %v463_v37 = vadd.f32 %v462_v48, %v459_v25 }
 0x181   : > { %v474_v35 = vadd.f32 %v473_v4, %v470_v26  ;;  %v485_v38 = vadd.f32 %v484_v7, %v481_v27  ;;  %v496_v40 = vadd.f32 %v495_v17, %v492_v19  ;;  %v507_v41 = vadd.f32 %v506_v18, %v503_v24 }
 0x182   : > { %433 = vst.msk [vmem:[%s2077_s6] sm:$0xff] %vm432_vm3, %v430_v32  ;;  %1216 = vst.msk [vmem:[%s2077_s6 + $0x10] sm:$0xff] %vm432_vm3, %v441_v33  ;;  %v423_v42 = vadd.f32 %v419_v31, %v409_v13  ;;  %v554_v43 = vadd.f32 %v552_v50, %v546_v16  ;;  %v567_v45 = vadd.f32 %v562_v28, %v553_v0  ;;  %v622_v31 = vstv %s2124_s26  ;;  %s2222_s26 = sld [smem:[#allocation8 + $0x16]] }
 0x183   : > { %1220 = vst.msk [vmem:[%s2077_s6 + $0x20] sm:$0xff] %vm432_vm3, %v452_v34  ;;  %1224 = vst.msk [vmem:[%s2077_s6 + $0x30] sm:$0xff] %vm432_vm3, %v463_v37  ;;  %v564_v46 = vpop.permute.xlu1 %563  ;;  %v576_v30 = vpop.permute.xlu0 %575  ;;  %v632_v28 = vstv %s2126_s8  ;;  %v642_v37 = vstv %s2129_s28  ;;  %s2225_s8 = sld [smem:[#allocation8 + $0x1a]]  ;;  %s2227_s28 = sld [smem:[#allocation8 + $0x1e]] }
 0x184   : > { %1228 = vst.msk [vmem:[%s2077_s6 + $0x40] sm:$0xff] %vm432_vm3, %v474_v35  ;;  %1232 = vst.msk [vmem:[%s2077_s6 + $0x50] sm:$0xff] %vm432_vm3, %v485_v38  ;;  %v427_v51 = vmul.f32 %v425_v53, %v423_v42  ;;  %v438_v62 = vmul.f32 %v436_v57, %v423_v42  ;;  %v449_v52 = vmul.f32 %v447_v60, %v423_v42  ;;  %v652_v35 = vstv %s2131_s29  ;;  %s2237_s29 = sld [smem:[#allocation7 + $0x21]] }
 0x185   : > { %1236 = vst.msk [vmem:[%s2077_s6 + $0x60] sm:$0xff] %vm432_vm3, %v496_v40  ;;  %1240 = vst.msk [vmem:[%s2077_s6 + $0x70] sm:$0xff] %vm432_vm3, %v507_v41  ;;  %v460_v50 = vmul.f32 %v458_v63, %v423_v42  ;;  %v471_v2 = vmul.f32 %v469_v3, %v423_v42  ;;  %v482_v6 = vmul.f32 %v480_v5, %v423_v42  ;;  %v662_v38 = vstv %s2133_s30  ;;  %s2269_s30 = sld [smem:[#allocation8 + $0x3]] }
 0x186   : > { %v493_v11 = vmul.f32 %v491_v9, %v423_v42  ;;  %v504_v13 = vmul.f32 %v502_v10, %v423_v42  ;;  %v431_v0 = vadd.f32 %v429_v56, %v427_v51  ;;  %v442_v16 = vadd.f32 %v440_v58, %v438_v62 }
 0x187   : > { %v453_v53 = vadd.f32 %v451_v36, %v449_v52  ;;  %v464_v57 = vadd.f32 %v462_v48, %v460_v50  ;;  %v475_v60 = vadd.f32 %v473_v4, %v471_v2  ;;  %v486_v63 = vadd.f32 %v484_v7, %v482_v6  ;;  %v578_v9 = vpop.permute.xlu1 %577  ;;  %v713_v10 = vpop.permute.xlu0 %712 }
 0x188   : > { %v497_v3 = vadd.f32 %v495_v17, %v493_v11  ;;  %v508_v5 = vadd.f32 %v506_v18, %v504_v13  ;;  %434 = vst.msk [vmem:[%s2077_s6 + $0x8] sm:$0xff] %vm432_vm3, %v431_v0  ;;  %1217 = vst.msk [vmem:[%s2077_s6 + $0x18] sm:$0xff] %vm432_vm3, %v442_v16  ;;  %v568_v56 = vadd.f32 %v564_v46, %v554_v43  ;;  %v703_v48 = vstv %s2075_s0  ;;  %s2218_s0 = sld [smem:[#allocation8 + $0xe]] }
 0x189   : > { %1221 = vst.msk [vmem:[%s2077_s6 + $0x28] sm:$0xff] %vm432_vm3, %v453_v53  ;;  %1225 = vst.msk [vmem:[%s2077_s6 + $0x38] sm:$0xff] %vm432_vm3, %v464_v57  ;;  %v581_v58 = vadd.f32 %v576_v30, %v567_v45  ;;  %v587_v36 = vmul.f32 %v586_v47, %v1917_v61  ;;  %v588_v17 = vmul.f32 %v586_v47, %v1923_v1  ;;  %v737_v1 = vstv %s2096_s9  ;;  %v620_v30 = vld [vmem:[%s2077_s6] sm:$0xff]  ;;  %s2220_s9 = sld [smem:[#allocation8 + $0x12]] }
 0x18a   : > { %1229 = vst.msk [vmem:[%s2077_s6 + $0x48] sm:$0xff] %vm432_vm3, %v475_v60  ;;  %1233 = vst.msk [vmem:[%s2077_s6 + $0x58] sm:$0xff] %vm432_vm3, %v486_v63  ;;  %v582_v4 = vadd.f32 %v578_v9, %v568_v56  ;;  %v704_v14 = vmul.f32 %v703_v48, %v1907_v54  ;;  %v738_v19 = vmul.f32 %v737_v1, %v1933_v8  ;;  %v672_v8 = vstv %s2135_s5  ;;  %v1253_v51 = vld [vmem:[%s2077_s6 + $0x10] sm:$0xff]  ;;  %s2271_s5 = sld [smem:[#allocation8 + $0x7]] }
 0x18b   : > { %1237 = vst.msk [vmem:[%s2077_s6 + $0x68] sm:$0xff] %vm432_vm3, %v497_v3  ;;  %1241 = vst.msk [vmem:[%s2077_s6 + $0x78] sm:$0xff] %vm432_vm3, %v508_v5  ;;  %v589_v7 = vadd.f32 %v587_v36, %v581_v58  ;;  %v715_v61 = vpop.permute.xlu1 %714  ;;  %v598_v18 = vpop.permute.xlu0 %597  ;;  %v705_v54 = vmul.f32 %v703_v48, %v1914_v59  ;;  %v682_v41 = vstv %s2138_s7  ;;  %v692_v59 = vstv %s2140_s11  ;;  %s2282_s7 = sld [smem:[#allocation8 + $0xb]]  ;;  %s2284_s11 = sld [smem:[#allocation8 + $0xf]] }
 0x18c   : > { %v590_v20 = vadd.f32 %v588_v17, %v582_v4  ;;  %v718_v22 = vadd.f32 %v713_v10, %v704_v14  ;;  %v739_v46 = vmul.f32 %v737_v1, %v1939_v12  ;;  %v1258_v2 = vld [vmem:[%s2077_s6 + $0x20] sm:$0xff]  ;;  %v1263_v6 = vld [vmem:[%s2077_s6 + $0x30] sm:$0xff] }
 0x18d   : > { %v603_v24 = vadd.f32 %v598_v18, %v589_v7  ;;  %v719_v33 = vadd.f32 %v715_v61, %v705_v54  ;;  %v1268_v11 = vld [vmem:[%s2077_s6 + $0x40] sm:$0xff]  ;;  %v1273_v9 = vld [vmem:[%s2077_s6 + $0x50] sm:$0xff] }
 0x18e   : > { %v1278_v10 = vld [vmem:[%s2077_s6 + $0x60] sm:$0xff]  ;;  %v1283_v56 = vld [vmem:[%s2077_s6 + $0x70] sm:$0xff] }
 0x18f   : > { %v600_v25 = vpop.permute.xlu1 %599  ;;  %v727_v26 = vpop.permute.xlu0 %726  ;;  %v621_v1 = vld [vmem:[%s2077_s6 + $0x8] sm:$0xff] }
 0x190   : > { %v732_v27 = vadd.f32 %v727_v26, %v718_v22  ;;  %v604_v43 = vadd.f32 %v600_v25, %v590_v20  ;;  %v773_v20 = vstv %s2150_s13  ;;  %v1254_v25 = vld [vmem:[%s2077_s6 + $0x18] sm:$0xff]  ;;  %v1259_v54 = vld [vmem:[%s2077_s6 + $0x28] sm:$0xff]  ;;  %s2290_s13 = sld [smem:[#allocation8 + $0x13]] }
 0x192   : > { %v740_v32 = vadd.f32 %v738_v19, %v732_v27 }
 0x193   : > { %v729_v34 = vpop.permute.xlu1 %728  ;;  %v612_v40 = vpop.permute.xlu0 %611 }
 0x194   : > { %v617_v42 = vadd.f32 %v612_v40, %v603_v24  ;;  %v733_v45 = vadd.f32 %v729_v34, %v719_v33  ;;  %v1264_v24 = vld [vmem:[%s2077_s6 + $0x38] sm:$0xff]  ;;  %v1269_v33 = vld [vmem:[%s2077_s6 + $0x48] sm:$0xff] }
 0x196   : > { %v623_v47 = vmul.f32 %v622_v31, %v617_v42  ;;  %v633_v62 = vmul.f32 %v632_v28, %v617_v42  ;;  %v643_v52 = vmul.f32 %v642_v37, %v617_v42  ;;  %v653_v50 = vmul.f32 %v652_v35, %v617_v42 }
 0x197   : > { %v663_v13 = vmul.f32 %v662_v38, %v617_v42  ;;  %v673_v0 = vmul.f32 %v672_v8, %v617_v42  ;;  %v683_v16 = vmul.f32 %v682_v41, %v617_v42  ;;  %v693_v53 = vmul.f32 %v692_v59, %v617_v42  ;;  %v614_v57 = vpop.permute.xlu1 %613  ;;  %v749_v12 = vpop.permute.xlu0 %748 }
 0x198   : > { %v625_v60 = vadd.f32 %v623_v47, %v620_v30  ;;  %v635_v63 = vadd.f32 %v1253_v51, %v633_v62  ;;  %v645_v3 = vadd.f32 %v1258_v2, %v643_v52  ;;  %v655_v5 = vadd.f32 %v1263_v6, %v653_v50 }
 0x199   : > { %v665_v58 = vadd.f32 %v1268_v11, %v663_v13  ;;  %v675_v36 = vadd.f32 %v1273_v9, %v673_v0  ;;  %v685_v48 = vadd.f32 %v1278_v10, %v683_v16  ;;  %v695_v4 = vadd.f32 %v1283_v56, %v693_v53 }
 0x19a   : > { %627 = vst.msk [vmem:[%s2077_s6] sm:$0xff] %vm432_vm3, %v625_v60  ;;  %1255 = vst.msk [vmem:[%s2077_s6 + $0x10] sm:$0xff] %vm432_vm3, %v635_v63  ;;  %v618_v7 = vadd.f32 %v614_v57, %v604_v43  ;;  %v741_v17 = vadd.f32 %v739_v46, %v733_v45  ;;  %v754_v61 = vadd.f32 %v749_v12, %v740_v32  ;;  %v1284_v46 = vld [vmem:[%s2077_s6 + $0x78] sm:$0xff]  ;;  %v890_v50 = vstv %s2164_s20  ;;  %s2292_s20 = sld [smem:[#allocation8 + $0x17]] }
 0x19b   : > { %1260 = vst.msk [vmem:[%s2077_s6 + $0x20] sm:$0xff] %vm432_vm3, %v645_v3  ;;  %1265 = vst.msk [vmem:[%s2077_s6 + $0x30] sm:$0xff] %vm432_vm3, %v655_v5  ;;  %v751_v18 = vpop.permute.xlu1 %750  ;;  %v763_v14 = vpop.permute.xlu0 %762  ;;  %v774_v52 = vmul.f32 %v773_v20, %v1953_v23  ;;  %v775_v11 = vmul.f32 %v773_v20, %v1959_v29  ;;  %v891_v0 = vmul.f32 %v890_v50, %v1943_v15  ;;  %v924_v29 = vstv %s2188_s23  ;;  %s2305_s23 = sld [smem:[#allocation8 + $0x1b]] }
 0x19c   : > { %1270 = vst.msk [vmem:[%s2077_s6 + $0x40] sm:$0xff] %vm432_vm3, %v665_v58  ;;  %1275 = vst.msk [vmem:[%s2077_s6 + $0x50] sm:$0xff] %vm432_vm3, %v675_v36  ;;  %v624_v22 = vmul.f32 %v622_v31, %v618_v7  ;;  %v634_v26 = vmul.f32 %v632_v28, %v618_v7  ;;  %v644_v27 = vmul.f32 %v642_v37, %v618_v7  ;;  %v1274_v37 = vld [vmem:[%s2077_s6 + $0x58] sm:$0xff]  ;;  %v809_v5 = vstv %s2211_s10  ;;  %s2310_s10 = sld [smem:[#allocation8 + $0x1f]] }
 0x19d   : > { %1280 = vst.msk [vmem:[%s2077_s6 + $0x60] sm:$0xff] %vm432_vm3, %v685_v48  ;;  %1285 = vst.msk [vmem:[%s2077_s6 + $0x70] sm:$0xff] %vm432_vm3, %v695_v4  ;;  %v654_v19 = vmul.f32 %v652_v35, %v618_v7  ;;  %v664_v34 = vmul.f32 %v662_v38, %v618_v7  ;;  %v674_v40 = vmul.f32 %v672_v8, %v618_v7  ;;  %v1279_v35 = vld [vmem:[%s2077_s6 + $0x68] sm:$0xff]  ;;  %v819_v9 = vstv %s2213_s27  ;;  %s1383_s27 = sshll.u32 %s1679_s19, 11 }
 0x19e   : > { %v684_v42 = vmul.f32 %v682_v41, %v618_v7  ;;  %v694_v32 = vmul.f32 %v692_v59, %v618_v7  ;;  %v626_v31 = vadd.f32 %v624_v22, %v621_v1  ;;  %v636_v43 = vadd.f32 %v1254_v25, %v634_v26 }
 0x19f   : > { %v646_v28 = vadd.f32 %v1259_v54, %v644_v27  ;;  %v656_v45 = vadd.f32 %v1264_v24, %v654_v19  ;;  %v666_v38 = vadd.f32 %v1269_v33, %v664_v34  ;;  %v676_v8 = vadd.f32 %v1274_v37, %v674_v40  ;;  %v765_v30 = vpop.permute.xlu1 %764  ;;  %v900_v47 = vpop.permute.xlu0 %899 }
 0x1a0   : > { %v686_v41 = vadd.f32 %v1279_v35, %v684_v42  ;;  %v696_v59 = vadd.f32 %v1284_v46, %v694_v32  ;;  %628 = vst.msk [vmem:[%s2077_s6 + $0x8] sm:$0xff] %vm432_vm3, %v626_v31  ;;  %1256 = vst.msk [vmem:[%s2077_s6 + $0x18] sm:$0xff] %vm432_vm3, %v636_v43  ;;  %v755_v51 = vadd.f32 %v751_v18, %v741_v17  ;;  %v829_v36 = vstv %s2216_s21  ;;  %s1087_s21 = sshll.u32 %s2077_s6, 4  ;;  %s2377_s21 = int_to_ptr.vmem [resolvable:$true] %s1087_s21 }
 0x1a1   : > { %1261 = vst.msk [vmem:[%s2077_s6 + $0x28] sm:$0xff] %vm432_vm3, %v646_v28  ;;  %1266 = vst.msk [vmem:[%s2077_s6 + $0x38] sm:$0xff] %vm432_vm3, %v656_v45  ;;  %v768_v62 = vadd.f32 %v763_v14, %v754_v61  ;;  %v905_v53 = vadd.f32 %v900_v47, %v891_v0  ;;  %v925_v63 = vmul.f32 %v924_v29, %v1969_v39  ;;  %v839_v48 = vstv %s2218_s0  ;;  %v807_v1 = vld [vmem:[%s2077_s6] sm:$0xff] }
 0x1a2   : > { %1271 = vst.msk [vmem:[%s2077_s6 + $0x48] sm:$0xff] %vm432_vm3, %v666_v38  ;;  %1276 = vst.msk [vmem:[%s2077_s6 + $0x58] sm:$0xff] %vm432_vm3, %v676_v8  ;;  %v769_v2 = vadd.f32 %v765_v30, %v755_v51  ;;  %v892_v15 = vmul.f32 %v890_v50, %v1950_v21  ;;  %v849_v4 = vstv %s2220_s9  ;;  %v859_v39 = vstv %s2222_s26  ;;  %s2375_s9 = scalar_lea.hbm %s2441_s4, %s1383_s27  ;;  %s1074_s26 = scalar_lea.sflag [#allocation5], %s1807_s12 }
 0x1a3   : > { %1281 = vst.msk [vmem:[%s2077_s6 + $0x68] sm:$0xff] %vm432_vm3, %v686_v41  ;;  %1286 = vst.msk [vmem:[%s2077_s6 + $0x78] sm:$0xff] %vm432_vm3, %v696_v59  ;;  %v776_v6 = vadd.f32 %v774_v52, %v768_v62  ;;  %v902_v23 = vpop.permute.xlu1 %901  ;;  %v785_v13 = vpop.permute.xlu0 %784  ;;  %v869_v21 = vstv %s2225_s8  ;;  %v879_v17 = vstv %s2227_s28  ;;  %v926_v20 = vmul.f32 %v924_v29, %v1975_v44  ;;  %s1544_s8 = scalar_lea.vmem %s2377_s21, 2048  ;;  %s1630_s28 = smov [#allocation11]  }
 0x1a4   : > { %v777_v16 = vadd.f32 %v775_v11, %v769_v2  ;;  %v906_v56 = vadd.f32 %v902_v23, %v892_v15  ;;  %v1298_v25 = vld [vmem:[%s2077_s6 + $0x10] sm:$0xff]  ;;  %v1303_v54 = vld [vmem:[%s2077_s6 + $0x20] sm:$0xff]  ;;  %v960_v2 = vstv %s2237_s29  ;;  %p1545_p12 = scmp.ne.s32.totalorder %s2377_s21, %s1544_s8  ;;  %s1548_s29 = sshll.u32 %s1630_s28, 4  ;;  %s1549_s29 = int_to_ptr.vmem [resolvable:$false] %s1548_s29 }
 0x1a5   : > { %v790_v3 = vadd.f32 %v785_v13, %v776_v6  ;;  %v1308_v24 = vld [vmem:[%s2077_s6 + $0x30] sm:$0xff]  ;;  %v1313_v33 = vld [vmem:[%s2077_s6 + $0x40] sm:$0xff]  ;;  %p1551_p2 = scmp.lt.s32.totalorder %s2377_s21, %s1549_s29 }
 0x1a6   : > { %v1318_v35 = vld [vmem:[%s2077_s6 + $0x50] sm:$0xff]  ;;  %v1323_v46 = vld [vmem:[%s2077_s6 + $0x60] sm:$0xff]  ;;  %p1546_p0 = pnand %p1545_p12, %p1759_p9 }
 0x1a7   : > { %v787_v57 = vpop.permute.xlu1 %786  ;;  %v914_v12 = vpop.permute.xlu0 %913  ;;  %v1328_v38 = vld [vmem:[%s2077_s6 + $0x70] sm:$0xff]  ;;  %v808_v6 = vld [vmem:[%s2077_s6 + $0x8] sm:$0xff]  ;;  %v1299_v23 = vld [vmem:[%s2077_s6 + $0x18] sm:$0xff] }
 0x1a8   : > { %v919_v60 = vadd.f32 %v914_v12, %v905_v53  ;;  %v791_v18 = vadd.f32 %v787_v57, %v777_v16  ;;  %v1304_v29 = vld [vmem:[%s2077_s6 + $0x28] sm:$0xff]  ;;  %v1309_v53 = vld [vmem:[%s2077_s6 + $0x38] sm:$0xff]  ;;  %p1547_p3 = pneg %p1546_p0 }
 0x1a9   : > { %v1314_v57 = vld [vmem:[%s2077_s6 + $0x48] sm:$0xff] }
 0x1aa   : > { %v927_v10 = vadd.f32 %v925_v63, %v919_v60 }
 0x1ab   : > { %v916_v58 = vpop.permute.xlu1 %915  ;;  %v799_v7 = vpop.permute.xlu0 %798 }
 0x1ac   : > { %v804_v61 = vadd.f32 %v799_v7, %v790_v3  ;;  %v920_v14 = vadd.f32 %v916_v58, %v906_v56  ;;  %v1319_v56 = vld [vmem:[%s2077_s6 + $0x58] sm:$0xff]  ;;  %v1324_v58 = vld [vmem:[%s2077_s6 + $0x68] sm:$0xff] }
 0x1ae   : > { %v810_v22 = vmul.f32 %v809_v5, %v804_v61  ;;  %v820_v26 = vmul.f32 %v819_v9, %v804_v61  ;;  %v830_v27 = vmul.f32 %v829_v36, %v804_v61  ;;  %v840_v19 = vmul.f32 %v839_v48, %v804_v61 }
 0x1af   : > { %v850_v34 = vmul.f32 %v849_v4, %v804_v61  ;;  %v860_v40 = vmul.f32 %v859_v39, %v804_v61  ;;  %v870_v44 = vmul.f32 %v869_v21, %v804_v61  ;;  %v880_v42 = vmul.f32 %v879_v17, %v804_v61  ;;  %v801_v32 = vpop.permute.xlu1 %800  ;;  %v936_v31 = vpop.permute.xlu0 %935 }
 0x1b0   : > { %v812_v43 = vadd.f32 %v810_v22, %v807_v1  ;;  %v822_v28 = vadd.f32 %v1298_v25, %v820_v26  ;;  %v832_v45 = vadd.f32 %v1303_v54, %v830_v27  ;;  %v842_v37 = vadd.f32 %v1308_v24, %v840_v19 }
 0x1b1   : > { %v852_v8 = vadd.f32 %v1313_v33, %v850_v34  ;;  %v862_v41 = vadd.f32 %v1318_v35, %v860_v40  ;;  %v872_v59 = vadd.f32 %v1323_v46, %v870_v44  ;;  %v882_v30 = vadd.f32 %v1328_v38, %v880_v42 }
 0x1b2   : > { %814 = vst.msk [vmem:[%s2077_s6] sm:$0xff] %vm432_vm3, %v812_v43  ;;  %1300 = vst.msk [vmem:[%s2077_s6 + $0x10] sm:$0xff] %vm432_vm3, %v822_v28  ;;  %v805_v47 = vadd.f32 %v801_v32, %v791_v18  ;;  %v928_v51 = vadd.f32 %v926_v20, %v920_v14  ;;  %v941_v62 = vadd.f32 %v936_v31, %v927_v10  ;;  %v996_v19 = vstv %s2269_s30  ;;  %s1550_s30 = scalar_lea.vmem %s1549_s29, 4096 }
 0x1b3   : > { %1305 = vst.msk [vmem:[%s2077_s6 + $0x20] sm:$0xff] %vm432_vm3, %v832_v45  ;;  %1310 = vst.msk [vmem:[%s2077_s6 + $0x30] sm:$0xff] %vm432_vm3, %v842_v37  ;;  %v938_v52 = vpop.permute.xlu1 %937  ;;  %v950_v50 = vpop.permute.xlu0 %949  ;;  %v961_v14 = vmul.f32 %v960_v2, %v1981_v49  ;;  %v962_v22 = vmul.f32 %v960_v2, %v1987_v55  ;;  %v1006_v54 = vstv %s2271_s5  ;;  %v1016_v24 = vstv %s2282_s7  ;;  %p1552_p4 = scmp.lt.s32.totalorder %s1550_s30, %s1544_s8 }
 0x1b4   : > { %1315 = vst.msk [vmem:[%s2077_s6 + $0x40] sm:$0xff] %vm432_vm3, %v852_v8  ;;  %1320 = vst.msk [vmem:[%s2077_s6 + $0x50] sm:$0xff] %vm432_vm3, %v862_v41  ;;  %v811_v11 = vmul.f32 %v809_v5, %v805_v47  ;;  %v821_v13 = vmul.f32 %v819_v9, %v805_v47  ;;  %v831_v0 = vmul.f32 %v829_v36, %v805_v47  ;;  %v1329_v36 = vld [vmem:[%s2077_s6 + $0x78] sm:$0xff]  ;;  %v1026_v33 = vstv %s2284_s11 }
 0x1b5   : > { %1325 = vst.msk [vmem:[%s2077_s6 + $0x60] sm:$0xff] %vm432_vm3, %v872_v59  ;;  %1330 = vst.msk [vmem:[%s2077_s6 + $0x70] sm:$0xff] %vm432_vm3, %v882_v30  ;;  %v841_v16 = vmul.f32 %v839_v48, %v805_v47  ;;  %v851_v12 = vmul.f32 %v849_v4, %v805_v47  ;;  %v861_v60 = vmul.f32 %v859_v39, %v805_v47  ;;  %v1036_v34 = vstv %s2290_s13  ;;  %p1553_p6 = por %p1552_p4, %p1551_p2 }
 0x1b6   : > { %v871_v63 = vmul.f32 %v869_v21, %v805_v47  ;;  %v881_v15 = vmul.f32 %v879_v17, %v805_v47  ;;  %v813_v3 = vadd.f32 %v811_v11, %v808_v6  ;;  %v823_v5 = vadd.f32 %v1299_v23, %v821_v13 }
 0x1b7   : > { %v833_v9 = vadd.f32 %v1304_v29, %v831_v0  ;;  %v843_v10 = vadd.f32 %v1309_v53, %v841_v16  ;;  %v853_v48 = vadd.f32 %v1314_v57, %v851_v12  ;;  %v863_v4 = vadd.f32 %v1319_v56, %v861_v60  ;;  %v952_v21 = vpop.permute.xlu1 %951  ;;  %v972_v17 = vpop.permute.xlu0 %971  ;;  %p1554_p8 = pnand %p1553_p6, %p1547_p3 }
 0x1b8   : > { %v873_v7 = vadd.f32 %v1324_v58, %v871_v63  ;;  %v883_v39 = vadd.f32 %v1329_v36, %v881_v15  ;;  %815 = vst.msk [vmem:[%s2077_s6 + $0x8] sm:$0xff] %vm432_vm3, %v813_v3  ;;  %1301 = vst.msk [vmem:[%s2077_s6 + $0x18] sm:$0xff] %vm432_vm3, %v823_v5  ;;  %v942_v61 = vadd.f32 %v938_v52, %v928_v51  ;;  %v1046_v40 = vstv %s2292_s20 }
 0x1b9   : > { %1306 = vst.msk [vmem:[%s2077_s6 + $0x28] sm:$0xff] %vm432_vm3, %v833_v9  ;;  %1311 = vst.msk [vmem:[%s2077_s6 + $0x38] sm:$0xff] %vm432_vm3, %v843_v10  ;;  %v955_v18 = vadd.f32 %v950_v50, %v941_v62  ;;  %v1056_v44 = vstv %s2305_s23  ;;  %v1066_v42 = vstv %s2310_s10 }
 0x1ba   : > { %1316 = vst.msk [vmem:[%s2077_s6 + $0x48] sm:$0xff] %vm432_vm3, %v853_v48  ;;  %1321 = vst.msk [vmem:[%s2077_s6 + $0x58] sm:$0xff] %vm432_vm3, %v863_v4  ;;  %v956_v20 = vadd.f32 %v952_v21, %v942_v61  ;;  %v994_v43 = vld [vmem:[%s2077_s6] sm:$0xff]  ;;  %v1343_v28 = vld [vmem:[%s2077_s6 + $0x10] sm:$0xff] }
 0x1bb   : > { %1326 = vst.msk [vmem:[%s2077_s6 + $0x68] sm:$0xff] %vm432_vm3, %v873_v7  ;;  %1331 = vst.msk [vmem:[%s2077_s6 + $0x78] sm:$0xff] %vm432_vm3, %v883_v39  ;;  %v963_v1 = vadd.f32 %v961_v14, %v955_v18  ;;  %v974_v25 = vpop.permute.xlu1 %973  ;;  %v986_v49 = vpop.permute.xlu0 %985  ;;  %v1348_v46 = vld [vmem:[%s2077_s6 + $0x20] sm:$0xff]  ;;  %v1353_v38 = vld [vmem:[%s2077_s6 + $0x30] sm:$0xff] }
 0x1bc   : > { %v964_v27 = vadd.f32 %v962_v22, %v956_v20  ;;  %v1358_v8 = vld [vmem:[%s2077_s6 + $0x40] sm:$0xff]  ;;  %v1363_v6 = vld [vmem:[%s2077_s6 + $0x50] sm:$0xff] }
 0x1bd   : > { %v977_v26 = vadd.f32 %v972_v17, %v963_v1  ;;  %v1368_v11 = vld [vmem:[%s2077_s6 + $0x60] sm:$0xff]  ;;  %v1373_v23 = vld [vmem:[%s2077_s6 + $0x70] sm:$0xff] }
 0x1be   : > { %v978_v31 = vadd.f32 %v974_v25, %v964_v27 }
 0x1bf   : > { %v991_v32 = vadd.f32 %v986_v49, %v977_v26  ;;  %v988_v51 = vpop.permute.xlu1 %987  ;;  %v995_v57 = vld [vmem:[%s2077_s6 + $0x8] sm:$0xff]  ;;  %v1344_v60 = vld [vmem:[%s2077_s6 + $0x18] sm:$0xff] }
 0x1c0   : > { %v992_v53 = vadd.f32 %v988_v51, %v978_v31  ;;  %v1349_v5 = vld [vmem:[%s2077_s6 + $0x28] sm:$0xff]  ;;  %v1354_v9 = vld [vmem:[%s2077_s6 + $0x38] sm:$0xff] }
 0x1c1   : > { %v997_v55 = vmul.f32 %v996_v19, %v991_v32  ;;  %v1007_v45 = vmul.f32 %v1006_v54, %v991_v32  ;;  %v1017_v37 = vmul.f32 %v1016_v24, %v991_v32  ;;  %v1027_v35 = vmul.f32 %v1026_v33, %v991_v32  ;;  %v1359_v10 = vld [vmem:[%s2077_s6 + $0x48] sm:$0xff]  ;;  %v1364_v17 = vld [vmem:[%s2077_s6 + $0x58] sm:$0xff] }
 0x1c2   : > { %v1037_v41 = vmul.f32 %v1036_v34, %v991_v32  ;;  %v1047_v59 = vmul.f32 %v1046_v40, %v991_v32  ;;  %v1057_v30 = vmul.f32 %v1056_v44, %v991_v32  ;;  %v1067_v47 = vmul.f32 %v1066_v42, %v991_v32  ;;  %v1369_v61 = vld [vmem:[%s2077_s6 + $0x68] sm:$0xff]  ;;  %v1374_v18 = vld [vmem:[%s2077_s6 + $0x78] sm:$0xff] }
 0x1c3   : > { %v999_v62 = vadd.f32 %v997_v55, %v994_v43  ;;  %v1009_v52 = vadd.f32 %v1343_v28, %v1007_v45  ;;  %v1019_v50 = vadd.f32 %v1348_v46, %v1017_v37  ;;  %v1029_v2 = vadd.f32 %v1353_v38, %v1027_v35 }
 0x1c4   : > { %v1039_v13 = vadd.f32 %v1358_v8, %v1037_v41  ;;  %v1049_v0 = vadd.f32 %v1363_v6, %v1047_v59  ;;  %v1059_v16 = vadd.f32 %v1368_v11, %v1057_v30  ;;  %v1069_v29 = vadd.f32 %v1373_v23, %v1067_v47 }
 0x1c5   : > { %1001 = vst.msk [vmem:[%s2077_s6] sm:$0xff] %vm432_vm3, %v999_v62  ;;  %1345 = vst.msk [vmem:[%s2077_s6 + $0x10] sm:$0xff] %vm432_vm3, %v1009_v52  ;;  %v998_v12 = vmul.f32 %v996_v19, %v992_v53  ;;  %v1008_v63 = vmul.f32 %v1006_v54, %v992_v53  ;;  %v1018_v15 = vmul.f32 %v1016_v24, %v992_v53 }
 0x1c6   : > { %1350 = vst.msk [vmem:[%s2077_s6 + $0x20] sm:$0xff] %vm432_vm3, %v1019_v50  ;;  %1355 = vst.msk [vmem:[%s2077_s6 + $0x30] sm:$0xff] %vm432_vm3, %v1029_v2  ;;  %v1028_v3 = vmul.f32 %v1026_v33, %v992_v53  ;;  %v1038_v56 = vmul.f32 %v1036_v34, %v992_v53  ;;  %v1048_v58 = vmul.f32 %v1046_v40, %v992_v53 }
 0x1c7   : > { %1360 = vst.msk [vmem:[%s2077_s6 + $0x40] sm:$0xff] %vm432_vm3, %v1039_v13  ;;  %1365 = vst.msk [vmem:[%s2077_s6 + $0x50] sm:$0xff] %vm432_vm3, %v1049_v0  ;;  %v1058_v36 = vmul.f32 %v1056_v44, %v992_v53  ;;  %v1068_v48 = vmul.f32 %v1066_v42, %v992_v53  ;;  %v1000_v4 = vadd.f32 %v998_v12, %v995_v57 }
 0x1c8   : > { %1370 = vst.msk [vmem:[%s2077_s6 + $0x60] sm:$0xff] %vm432_vm3, %v1059_v16  ;;  %1375 = vst.msk [vmem:[%s2077_s6 + $0x70] sm:$0xff] %vm432_vm3, %v1069_v29  ;;  %v1010_v7 = vadd.f32 %v1344_v60, %v1008_v63  ;;  %v1020_v39 = vadd.f32 %v1349_v5, %v1018_v15  ;;  %v1030_v21 = vadd.f32 %v1354_v9, %v1028_v3 }
 0x1c9   : > { %v1040_v14 = vadd.f32 %v1359_v10, %v1038_v56  ;;  %v1050_v20 = vadd.f32 %v1364_v17, %v1048_v58  ;;  %v1060_v1 = vadd.f32 %v1369_v61, %v1058_v36  ;;  %v1070_v22 = vadd.f32 %v1374_v18, %v1068_v48  ;;  %1002 = vst.msk [vmem:[%s2077_s6 + $0x8] sm:$0xff] %vm432_vm3, %v1000_v4 }
 0x1ca   : > { %1346 = vst.msk [vmem:[%s2077_s6 + $0x18] sm:$0xff] %vm432_vm3, %v1010_v7  ;;  %1351 = vst.msk [vmem:[%s2077_s6 + $0x28] sm:$0xff] %vm432_vm3, %v1020_v39 }
 0x1cb   : > { %1356 = vst.msk [vmem:[%s2077_s6 + $0x38] sm:$0xff] %vm432_vm3, %v1030_v21  ;;  %1361 = vst.msk [vmem:[%s2077_s6 + $0x48] sm:$0xff] %vm432_vm3, %v1040_v14 }
 0x1cc   : > { %1366 = vst.msk [vmem:[%s2077_s6 + $0x58] sm:$0xff] %vm432_vm3, %v1050_v20  ;;  %1371 = vst.msk [vmem:[%s2077_s6 + $0x68] sm:$0xff] %vm432_vm3, %v1060_v1 }
 0x1cd   : > { %1376 = vst.msk [vmem:[%s2077_s6 + $0x78] sm:$0xff] %vm432_vm3, %v1070_v22 }
 0x1ce   : > { %1557 = shalt.err (!%p1554_p8)
}
 0x1cf   : > { %s1558_s6 = scalar_lea.hbm %s2375_s9, 2048  ;;  %s1562_s11 = scalar_lea.hbm %s2441_s4, 4096 }
 0x1d0   : > { %p1559_p1 = scmp.ne.s32.totalorder %s2375_s9, %s1558_s6  ;;  %p1563_p13 = scmp.lt.u32.totalorder %s2375_s9, %s2441_s4 }
 0x1d1   : > { %p1564_p7 = scmp.lt.u32.totalorder %s1562_s11, %s1558_s6  ;;  %p1566_p12 = scmp.lt.u32.totalorder %s1558_s6, %s2375_s9 }
 0x1d2   : > { %p1560_p5 = pnand %p1559_p1, %p1759_p9 }
 0x1d3   : > { %p1565_p10 = por %p1564_p7, %p1563_p13 }
 0x1d4   : > { %p1561_p11 = pneg %p1560_p5 }
 0x1d5   : > { %p1567_p0 = por %p1566_p12, %p1565_p10 }
 0x1d7   : > { %p1568_p3 = pnand %p1567_p0, %p1561_p11 }
 0x1d9   : > { %1571 = shalt.err (!%p1568_p3)
}
 0x1da   : > { %s1631_s23 = smov 128   ;;  %s1632_s10 = smov 8  }
 0x1db   : > { %1398 = dma.vmem_to_hbm [thread:$0]  (%p1759_p9), %s2377_s21, 2048, %s2375_s9, %s1074_s26, %s1631_s23, %s1631_s23, %s1632_s10  }
 0x1dc PF: > { %s1102_s27 = sand.u32 1, %s1606_s15   ;;  %p2460_p2 = scmp.ne.s32.totalorder %s2447_s22, 0 }
 0x1dd   : > { %p2461_p4 = scmp.ge.s32.totalorder %s1618_s18, 2  ;;  %s1103_s19 = scalar_lea.sflag [#allocation5], %s1102_s27 }
 0x1df   : > { %p1415_p6 = pnand %p2461_p4, %p2460_p2 }
 0x1e1   : > { %1601 = dma.done.wait (!%p1415_p6), %s1103_s19, 2048  }
 0x1e2   : > { %1603 = vsyncadd (!%p1415_p6), %s1103_s19, 4294965248  ;;  %p19_p8 = scmp.ge.s32.totalorder %s1745_s14, 4   ;;  %s2462_s15 = smov %s1610_s16 }
 0x1e3   : > { %s2463_s16 = smov %s1614_s17  ;;  %s2464_s17 = smov %s1755_s24 }
 0x1e4   : > { %s2465_s18 = smov %s1745_s14  ;;  %21 = sbr.rel (!%p19_p8) target bundleno = 9 (0x9), region = 104 }
 0x1eb   :  { %1108 = vsyncpa [#allocation4], 1 }
 0x1ec   :  { %1110 = vsyncpa [#allocation4 + $0x1], 1 }
 0x1ed   :  { %1111 = vsyncpa [#allocation5], 1 }
 0x1ee   :  { %1113 = vsyncpa [#allocation5 + $0x1], 1 }
 0x1ef   :  { %1114 = vsyncpa [#allocation6], 1 }
 0x1f0   :  { %1116 = vsyncpa [#allocation6 + $0x1], 1 }
 0x1f1   :  { %1117 = vsyncpa [#allocation9], 1 }

</bundles_post_ra>
